<compile_context>
chip_gen: v5e
topology: v5e:2x2
jax: 0.10.0
libtpu: 0.0.40
codegen_flags: <defaults>
</compile_context>

<pallas_src>
import functools

import jax
import jax.numpy as jnp
from jax.experimental import pallas as pl
from jax.experimental.pallas import tpu as pltpu

BN_EPS = 1e-5
HEAD_PAD = 128          # lane-dense width for the final 1-wide head
PSLAB_W = 1024          # packed parameter-slab width

# column layout inside the (2, PSLAB_W) parameter slab
#   row 0 = gamma (and the padded layer-4 bias), row 1 = beta
_G1 = (0, 512)          # gamma1 / beta1
_G2 = (512, 256)        # gamma2 / beta2
_G3 = (768, 64)         # gamma3 / beta3
_B4 = (896, HEAD_PAD)   # layer-4 bias, zero-padded to 128 lanes (row 0 only)


def _basic_fc_kernel(
    x_ref,                      # (N, inp_len)   f32   (per-grid-step block)
    w1_ref,                     # (inp_len, 512) bf16  (resident across grid)
    w2_ref,                     # (512, 256)     bf16
    w3_ref,                     # (256, 64)      bf16
    w4_ref,                     # (64, 128)      bf16  (zero-padded head)
    p_ref,                      # (2, 1024)      f32   packed gamma/beta/b4 slab
    out_ref,                    # (N, 128)       f32   (only column 0 meaningful)
):
    """One independent forward (one BN batch) per grid step."""

    def mxu(h_f32, w_ref):
        # MXU matmul: bf16 operands, f32 accumulation.
        return jnp.dot(h_f32.astype(jnp.bfloat16), w_ref[...],
                       preferred_element_type=jnp.float32)

    def bn_relu(y, start, size):
        # Batch-stat BatchNorm (biased variance) + affine + ReLU, all f32 VPU.
        gamma = p_ref[0:1, start:start + size]
        beta = p_ref[1:2, start:start + size]
        mean = jnp.mean(y, axis=0, keepdims=True)
        centered = y - mean                                   # reused for var
        var = jnp.mean(centered * centered, axis=0, keepdims=True)
        y_hat = centered * jax.lax.rsqrt(var + BN_EPS)
        return jnp.maximum(y_hat * gamma + beta, 0.0)

    h = bn_relu(mxu(x_ref[...], w1_ref), *_G1)                # layer 1
    h = bn_relu(mxu(h, w2_ref), *_G2)                         # layer 2
    h = bn_relu(mxu(h, w3_ref), *_G3)                         # layer 3
    # head: Linear(64,1) padded to 128 lanes; padded columns -> sigmoid(0)=0.5
    # garbage discarded by the wrapper slice.
    logits = mxu(h, w4_ref) + p_ref[0:1, _B4[0]:_B4[0] + _B4[1]]
    out_ref[...] = 0.5 * (jnp.tanh(0.5 * logits) + 1.0)       # sigmoid via EUP tanh


def init_params(key, inp_len, dtype=jnp.float32):
    """Synthetic parameters with the same shapes as the PyTorch module."""
    dims = [(inp_len, 512), (512, 256), (256, 64), (64, 1)]
    params = {}
    keys = jax.random.split(key, 3 * len(dims))
    for i, (fin, fout) in enumerate(dims):
        scale = 1.0 / jnp.sqrt(jnp.asarray(fin, dtype))
        params[f"w{i + 1}"] = jax.random.uniform(
            keys[3 * i], (fin, fout), dtype, -scale, scale)
        params[f"b{i + 1}"] = jax.random.uniform(
            keys[3 * i + 1], (fout,), dtype, -scale, scale)
        if fout != 1:  # BatchNorm affine params (layers 1-3 only)
            noise = 0.1 * jax.random.normal(keys[3 * i + 2], (2, fout), dtype)
            params[f"g{i + 1}"] = 1.0 + noise[0]
            params[f"be{i + 1}"] = noise[1]
    return params


def pack_params(params):
    """Pre-pack / pre-cast parameters for the kernel (done once, outside jit).

    Linear biases b1-b3 are intentionally dropped: BN mean-centering cancels
    them exactly, so the forward output is unchanged.
    """
    packed = {
        "w1": params["w1"].astype(jnp.bfloat16),
        "w2": params["w2"].astype(jnp.bfloat16),
        "w3": params["w3"].astype(jnp.bfloat16),
        "w4": jnp.pad(params["w4"],
                      ((0, 0), (0, HEAD_PAD - 1))).astype(jnp.bfloat16),
    }
    slab = jnp.zeros((2, PSLAB_W), jnp.float32)
    slab = slab.at[0, _G1[0]:_G1[0] + _G1[1]].set(params["g1"])
    slab = slab.at[1, _G1[0]:_G1[0] + _G1[1]].set(params["be1"])
    slab = slab.at[0, _G2[0]:_G2[0] + _G2[1]].set(params["g2"])
    slab = slab.at[1, _G2[0]:_G2[0] + _G2[1]].set(params["be2"])
    slab = slab.at[0, _G3[0]:_G3[0] + _G3[1]].set(params["g3"])
    slab = slab.at[1, _G3[0]:_G3[0] + _G3[1]].set(params["be3"])
    slab = slab.at[0, _B4[0]:_B4[0] + 1].set(params["b4"])
    packed["pslab"] = slab
    return packed


@jax.jit
def basic_fc_forward_batched(x_batched, packed):
    """B independent forwards in one pallas_call.

    x_batched: (B, N, inp_len) f32 -> (B, N, 1) f32.
    Each b is an independent BatchNorm batch of N rows (same semantics as
    calling the PyTorch module B times on N-row batches).
    """
    b_dim, n, inp = x_batched.shape
    w1, w2, w3, w4, pslab = (packed["w1"], packed["w2"], packed["w3"],
                             packed["w4"], packed["pslab"])

    # advisory cost estimate (per-call totals)
    flops = 2 * b_dim * n * (inp * 512 + 512 * 256 + 256 * 64 + 64 * HEAD_PAD)
    transcendentals = b_dim * (n * HEAD_PAD + 512 + 256 + 64)
    bytes_accessed = (w1.size + w2.size + w3.size + w4.size) * 2 \
        + pslab.size * 4 + b_dim * n * (inp + HEAD_PAD) * 4

    out = pl.pallas_call(
        _basic_fc_kernel,
        out_shape=jax.ShapeDtypeStruct((b_dim, n, HEAD_PAD), jnp.float32),
        grid=(b_dim,),
        in_specs=[
            # per-step input block
            pl.BlockSpec((None, n, inp), lambda b: (b, 0, 0)),
            # weights / params: same block for every b -> loaded once, resident
            pl.BlockSpec(w1.shape, lambda b: (0, 0)),
            pl.BlockSpec(w2.shape, lambda b: (0, 0)),
            pl.BlockSpec(w3.shape, lambda b: (0, 0)),
            pl.BlockSpec(w4.shape, lambda b: (0, 0)),
            pl.BlockSpec(pslab.shape, lambda b: (0, 0)),
        ],
        out_specs=pl.BlockSpec((None, n, HEAD_PAD), lambda b: (b, 0, 0)),
        compiler_params=pltpu.CompilerParams(
            dimension_semantics=("parallel",)),
        cost_estimate=pl.CostEstimate(
            flops=int(flops),
            transcendentals=int(transcendentals),
            bytes_accessed=int(bytes_accessed)),
    )(x_batched, w1, w2, w3, w4, pslab)
    return out[..., :1]   # (B, N, 1); drop the 127 padded head columns


def basic_fc_forward(x, packed):
    """Module-equivalent signature: (N, inp_len) -> (N, 1)."""
    return basic_fc_forward_batched(x[None], packed)[0]


def _reference_forward(x, params):
    """Pure-JAX f32 reference (matches the PyTorch module's forward, biases kept)."""
    hi = jax.lax.Precision.HIGHEST

    def bn_relu(y, g, be):
        mean = y.mean(0, keepdims=True)
        var = ((y - mean) ** 2).mean(0, keepdims=True)
        return jnp.maximum((y - mean) / jnp.sqrt(var + BN_EPS) * g + be, 0.0)

    h = x
    h = bn_relu(jnp.dot(h, params["w1"], precision=hi) + params["b1"],
                params["g1"], params["be1"])
    h = bn_relu(jnp.dot(h, params["w2"], precision=hi) + params["b2"],
                params["g2"], params["be2"])
    h = bn_relu(jnp.dot(h, params["w3"], precision=hi) + params["b3"],
                params["g3"], params["be3"])
    return jax.nn.sigmoid(jnp.dot(h, params["w4"], precision=hi) + params["b4"])


if __name__ == "__main__":
    # Small shapes consistent with the module: B=4 independent forwards,
    # batch N=8 rows each, inp_len=256.
    B, N, INP_LEN = 4, 8, 256

    key = jax.random.PRNGKey(0)
    k_x, k_p = jax.random.split(key)
    x = jax.random.normal(k_x, (B, N, INP_LEN), jnp.float32)
    params = init_params(k_p, INP_LEN)
    packed = pack_params(params)

    out = basic_fc_forward_batched(x, packed)
    jax.block_until_ready(out)

    # sanity checks against the pure-JAX f32 reference (kernel uses bf16 MXU
    # operands, hence the loosened tolerance)
    ref = jax.vmap(lambda xb: _reference_forward(xb, params))(x)
    assert out.shape == (B, N, 1)
    assert bool(jnp.all((out > 0.0) & (out < 1.0)))
    assert jnp.allclose(out, ref, atol=2e-2, rtol=2e-2)

    # module-equivalent single-forward path
    out1 = basic_fc_forward(x[0], packed)
    jax.block_until_ready(out1)
    assert out1.shape == (N, 1)
    assert jnp.allclose(out1, ref[0], atol=2e-2, rtol=2e-2)

    print("KERNEL_OK")
</pallas_src>

<mosaic_0001>
module attributes {stable_mosaic.version = 11 : i64} {
  func.func @_basic_fc_kernel(%arg0: i32, %arg1: memref<1x8x256xf32, #tpu.memory_space<vmem>>, %arg2: memref<256x512xbf16, #tpu.memory_space<vmem>>, %arg3: memref<512x256xbf16, #tpu.memory_space<vmem>>, %arg4: memref<256x64xbf16, #tpu.memory_space<vmem>>, %arg5: memref<64x128xbf16, #tpu.memory_space<vmem>>, %arg6: memref<2x1024xf32, #tpu.memory_space<vmem>>, %arg7: memref<1x8x128xf32, #tpu.memory_space<vmem>>) attributes {dimension_semantics = [#tpu.dimension_semantics<parallel>], iteration_bounds = array<i64: 4>, scalar_prefetch = 0 : i64, scratch_operands = 0 : i64, tpu.core_type = #tpu.core_type<tc>, window_params = [{transform_indices = @transform_0, window_bounds = array<i64: 1, 8, 256>}, {pipeline_mode = #tpu.pipeline_mode<synchronous>, transform_indices = @transform_1, window_bounds = array<i64: 256, 512>}, {pipeline_mode = #tpu.pipeline_mode<synchronous>, transform_indices = @transform_2, window_bounds = array<i64: 512, 256>}, {pipeline_mode = #tpu.pipeline_mode<synchronous>, transform_indices = @transform_3, window_bounds = array<i64: 256, 64>}, {pipeline_mode = #tpu.pipeline_mode<synchronous>, transform_indices = @transform_4, window_bounds = array<i64: 64, 128>}, {pipeline_mode = #tpu.pipeline_mode<synchronous>, transform_indices = @transform_5, window_bounds = array<i64: 2, 1024>}, {transform_indices = @transform_6, window_bounds = array<i64: 1, 8, 128>}]} {
    %c0 = arith.constant 0 : index
    %c0_0 = arith.constant 0 : index
    %c0_1 = arith.constant 0 : index
    %0 = vector.load %arg1[%c0, %c0_0, %c0_1] : memref<1x8x256xf32, #tpu.memory_space<vmem>>, vector<1x8x256xf32>
    %1 = vector.shape_cast %0 : vector<1x8x256xf32> to vector<8x256xf32>
    %2 = arith.truncf %1 : vector<8x256xf32> to vector<8x256xbf16>
    %c0_2 = arith.constant 0 : index
    %c0_3 = arith.constant 0 : index
    %3 = vector.load %arg2[%c0_2, %c0_3] : memref<256x512xbf16, #tpu.memory_space<vmem>>, vector<256x512xbf16>
    %cst = arith.constant dense<0.000000e+00> : vector<8x512xf32>
    %4 = tpu.matmul %2, %3, %cst {dimension_numbers = #tpu.dot_dimension_numbers<[1], [0], [0], [1], [0, 0, 1, 1], [], []>} : vector<8x256xbf16>, vector<256x512xbf16>, vector<8x512xf32> -> vector<8x512xf32>
    %c0_4 = arith.constant 0 : index
    %c0_5 = arith.constant 0 : index
    %5 = vector.load %arg6[%c0_4, %c0_5] : memref<2x1024xf32, #tpu.memory_space<vmem>>, vector<1x512xf32>
    %c1 = arith.constant 1 : index
    %c0_6 = arith.constant 0 : index
    %6 = vector.load %arg6[%c1, %c0_6] : memref<2x1024xf32, #tpu.memory_space<vmem>>, vector<1x512xf32>
    %cst_7 = arith.constant dense<0.000000e+00> : vector<512xf32>
    %7 = vector.multi_reduction <add>, %4, %cst_7 [0] : vector<8x512xf32> to vector<512xf32>
    %8 = vector.shape_cast %7 : vector<512xf32> to vector<1x512xf32>
    %cst_8 = arith.constant 8.000000e+00 : f32
    %9 = vector.broadcast %cst_8 : f32 to vector<1x512xf32>
    %10 = arith.divf %8, %9 : vector<1x512xf32>
    %11 = vector.broadcast %10 : vector<1x512xf32> to vector<8x512xf32>
    %12 = arith.subf %4, %11 : vector<8x512xf32>
    %13 = arith.mulf %12, %12 : vector<8x512xf32>
    %cst_9 = arith.constant dense<0.000000e+00> : vector<512xf32>
    %14 = vector.multi_reduction <add>, %13, %cst_9 [0] : vector<8x512xf32> to vector<512xf32>
    %15 = vector.shape_cast %14 : vector<512xf32> to vector<1x512xf32>
    %cst_10 = arith.constant 8.000000e+00 : f32
    %16 = vector.broadcast %cst_10 : f32 to vector<1x512xf32>
    %17 = arith.divf %15, %16 : vector<1x512xf32>
    %cst_11 = arith.constant 9.99999974E-6 : f32
    %18 = vector.broadcast %cst_11 : f32 to vector<1x512xf32>
    %19 = arith.addf %17, %18 : vector<1x512xf32>
    %20 = math.rsqrt %19 : vector<1x512xf32>
    %21 = vector.broadcast %20 : vector<1x512xf32> to vector<8x512xf32>
    %22 = arith.mulf %12, %21 : vector<8x512xf32>
    %23 = vector.broadcast %5 : vector<1x512xf32> to vector<8x512xf32>
    %24 = arith.mulf %22, %23 : vector<8x512xf32>
    %25 = vector.broadcast %6 : vector<1x512xf32> to vector<8x512xf32>
    %26 = arith.addf %24, %25 : vector<8x512xf32>
    %cst_12 = arith.constant 0.000000e+00 : f32
    %27 = vector.broadcast %cst_12 : f32 to vector<8x512xf32>
    %28 = arith.maximumf %26, %27 : vector<8x512xf32>
    %29 = arith.truncf %28 : vector<8x512xf32> to vector<8x512xbf16>
    %c0_13 = arith.constant 0 : index
    %c0_14 = arith.constant 0 : index
    %30 = vector.load %arg3[%c0_13, %c0_14] : memref<512x256xbf16, #tpu.memory_space<vmem>>, vector<512x256xbf16>
    %cst_15 = arith.constant dense<0.000000e+00> : vector<8x256xf32>
    %31 = tpu.matmul %29, %30, %cst_15 {dimension_numbers = #tpu.dot_dimension_numbers<[1], [0], [0], [1], [0, 0, 1, 1], [], []>} : vector<8x512xbf16>, vector<512x256xbf16>, vector<8x256xf32> -> vector<8x256xf32>
    %c0_16 = arith.constant 0 : index
    %c512 = arith.constant 512 : index
    %32 = vector.load %arg6[%c0_16, %c512] : memref<2x1024xf32, #tpu.memory_space<vmem>>, vector<1x256xf32>
    %c1_17 = arith.constant 1 : index
    %c512_18 = arith.constant 512 : index
    %33 = vector.load %arg6[%c1_17, %c512_18] : memref<2x1024xf32, #tpu.memory_space<vmem>>, vector<1x256xf32>
    %cst_19 = arith.constant dense<0.000000e+00> : vector<256xf32>
    %34 = vector.multi_reduction <add>, %31, %cst_19 [0] : vector<8x256xf32> to vector<256xf32>
    %35 = vector.shape_cast %34 : vector<256xf32> to vector<1x256xf32>
    %cst_20 = arith.constant 8.000000e+00 : f32
    %36 = vector.broadcast %cst_20 : f32 to vector<1x256xf32>
    %37 = arith.divf %35, %36 : vector<1x256xf32>
    %38 = vector.broadcast %37 : vector<1x256xf32> to vector<8x256xf32>
    %39 = arith.subf %31, %38 : vector<8x256xf32>
    %40 = arith.mulf %39, %39 : vector<8x256xf32>
    %cst_21 = arith.constant dense<0.000000e+00> : vector<256xf32>
    %41 = vector.multi_reduction <add>, %40, %cst_21 [0] : vector<8x256xf32> to vector<256xf32>
    %42 = vector.shape_cast %41 : vector<256xf32> to vector<1x256xf32>
    %cst_22 = arith.constant 8.000000e+00 : f32
    %43 = vector.broadcast %cst_22 : f32 to vector<1x256xf32>
    %44 = arith.divf %42, %43 : vector<1x256xf32>
    %cst_23 = arith.constant 9.99999974E-6 : f32
    %45 = vector.broadcast %cst_23 : f32 to vector<1x256xf32>
    %46 = arith.addf %44, %45 : vector<1x256xf32>
    %47 = math.rsqrt %46 : vector<1x256xf32>
    %48 = vector.broadcast %47 : vector<1x256xf32> to vector<8x256xf32>
    %49 = arith.mulf %39, %48 : vector<8x256xf32>
    %50 = vector.broadcast %32 : vector<1x256xf32> to vector<8x256xf32>
    %51 = arith.mulf %49, %50 : vector<8x256xf32>
    %52 = vector.broadcast %33 : vector<1x256xf32> to vector<8x256xf32>
    %53 = arith.addf %51, %52 : vector<8x256xf32>
    %cst_24 = arith.constant 0.000000e+00 : f32
    %54 = vector.broadcast %cst_24 : f32 to vector<8x256xf32>
    %55 = arith.maximumf %53, %54 : vector<8x256xf32>
    %56 = arith.truncf %55 : vector<8x256xf32> to vector<8x256xbf16>
    %c0_25 = arith.constant 0 : index
    %c0_26 = arith.constant 0 : index
    %57 = vector.load %arg4[%c0_25, %c0_26] : memref<256x64xbf16, #tpu.memory_space<vmem>>, vector<256x64xbf16>
    %cst_27 = arith.constant dense<0.000000e+00> : vector<8x64xf32>
    %58 = tpu.matmul %56, %57, %cst_27 {dimension_numbers = #tpu.dot_dimension_numbers<[1], [0], [0], [1], [0, 0, 1, 1], [], []>} : vector<8x256xbf16>, vector<256x64xbf16>, vector<8x64xf32> -> vector<8x64xf32>
    %c0_28 = arith.constant 0 : index
    %c768 = arith.constant 768 : index
    %59 = vector.load %arg6[%c0_28, %c768] : memref<2x1024xf32, #tpu.memory_space<vmem>>, vector<1x64xf32>
    %c1_29 = arith.constant 1 : index
    %c768_30 = arith.constant 768 : index
    %60 = vector.load %arg6[%c1_29, %c768_30] : memref<2x1024xf32, #tpu.memory_space<vmem>>, vector<1x64xf32>
    %cst_31 = arith.constant dense<0.000000e+00> : vector<64xf32>
    %61 = vector.multi_reduction <add>, %58, %cst_31 [0] : vector<8x64xf32> to vector<64xf32>
    %62 = vector.shape_cast %61 : vector<64xf32> to vector<1x64xf32>
    %cst_32 = arith.constant 8.000000e+00 : f32
    %63 = vector.broadcast %cst_32 : f32 to vector<1x64xf32>
    %64 = arith.divf %62, %63 : vector<1x64xf32>
    %65 = vector.broadcast %64 : vector<1x64xf32> to vector<8x64xf32>
    %66 = arith.subf %58, %65 : vector<8x64xf32>
    %67 = arith.mulf %66, %66 : vector<8x64xf32>
    %cst_33 = arith.constant dense<0.000000e+00> : vector<64xf32>
    %68 = vector.multi_reduction <add>, %67, %cst_33 [0] : vector<8x64xf32> to vector<64xf32>
    %69 = vector.shape_cast %68 : vector<64xf32> to vector<1x64xf32>
    %cst_34 = arith.constant 8.000000e+00 : f32
    %70 = vector.broadcast %cst_34 : f32 to vector<1x64xf32>
    %71 = arith.divf %69, %70 : vector<1x64xf32>
    %cst_35 = arith.constant 9.99999974E-6 : f32
    %72 = vector.broadcast %cst_35 : f32 to vector<1x64xf32>
    %73 = arith.addf %71, %72 : vector<1x64xf32>
    %74 = math.rsqrt %73 : vector<1x64xf32>
    %75 = vector.broadcast %74 : vector<1x64xf32> to vector<8x64xf32>
    %76 = arith.mulf %66, %75 : vector<8x64xf32>
    %77 = vector.broadcast %59 : vector<1x64xf32> to vector<8x64xf32>
    %78 = arith.mulf %76, %77 : vector<8x64xf32>
    %79 = vector.broadcast %60 : vector<1x64xf32> to vector<8x64xf32>
    %80 = arith.addf %78, %79 : vector<8x64xf32>
    %cst_36 = arith.constant 0.000000e+00 : f32
    %81 = vector.broadcast %cst_36 : f32 to vector<8x64xf32>
    %82 = arith.maximumf %80, %81 : vector<8x64xf32>
    %83 = arith.truncf %82 : vector<8x64xf32> to vector<8x64xbf16>
    %c0_37 = arith.constant 0 : index
    %c0_38 = arith.constant 0 : index
    %84 = vector.load %arg5[%c0_37, %c0_38] : memref<64x128xbf16, #tpu.memory_space<vmem>>, vector<64x128xbf16>
    %cst_39 = arith.constant dense<0.000000e+00> : vector<8x128xf32>
    %85 = tpu.matmul %83, %84, %cst_39 {dimension_numbers = #tpu.dot_dimension_numbers<[1], [0], [0], [1], [0, 0, 1, 1], [], []>} : vector<8x64xbf16>, vector<64x128xbf16>, vector<8x128xf32> -> vector<8x128xf32>
    %c0_40 = arith.constant 0 : index
    %c896 = arith.constant 896 : index
    %86 = vector.load %arg6[%c0_40, %c896] : memref<2x1024xf32, #tpu.memory_space<vmem>>, vector<1x128xf32>
    %87 = vector.broadcast %86 : vector<1x128xf32> to vector<8x128xf32>
    %88 = arith.addf %85, %87 : vector<8x128xf32>
    %cst_41 = arith.constant 5.000000e-01 : f32
    %89 = vector.broadcast %cst_41 : f32 to vector<8x128xf32>
    %90 = arith.mulf %89, %88 : vector<8x128xf32>
    %91 = math.tanh %90 : vector<8x128xf32>
    %cst_42 = arith.constant 1.000000e+00 : f32
    %92 = vector.broadcast %cst_42 : f32 to vector<8x128xf32>
    %93 = arith.addf %91, %92 : vector<8x128xf32>
    %cst_43 = arith.constant 5.000000e-01 : f32
    %94 = vector.broadcast %cst_43 : f32 to vector<8x128xf32>
    %95 = arith.mulf %94, %93 : vector<8x128xf32>
    %c0_44 = arith.constant 0 : index
    %c0_45 = arith.constant 0 : index
    %c0_46 = arith.constant 0 : index
    %96 = vector.load %arg7[%c0_44, %c0_45, %c0_46] : memref<1x8x128xf32, #tpu.memory_space<vmem>>, vector<1x8x128xf32>
    %97 = vector.shape_cast %96 : vector<1x8x128xf32> to vector<8x128xf32>
    %98 = vector.shape_cast %95 : vector<8x128xf32> to vector<1x8x128xf32>
    tpu.vector_store %arg7[%c0_44, %c0_45, %c0_46], %98 {strides = array<i32>} : memref<1x8x128xf32, #tpu.memory_space<vmem>>, vector<1x8x128xf32>,
    return
  }
  func.func @transform_0(%arg0: i32) -> (i32, i32, i32) {
    %c0_i32 = arith.constant 0 : i32
    %c0_i32_0 = arith.constant 0 : i32
    %c0_i32_1 = arith.constant 0 : i32
    return %arg0, %c0_i32, %c0_i32_0 : i32, i32, i32
  }
  func.func @transform_1(%arg0: i32) -> (i32, i32) {
    %c0_i32 = arith.constant 0 : i32
    %c0_i32_0 = arith.constant 0 : i32
    %c0_i32_1 = arith.constant 0 : i32
    return %c0_i32, %c0_i32_0 : i32, i32
  }
  func.func @transform_2(%arg0: i32) -> (i32, i32) {
    %c0_i32 = arith.constant 0 : i32
    %c0_i32_0 = arith.constant 0 : i32
    %c0_i32_1 = arith.constant 0 : i32
    return %c0_i32, %c0_i32_0 : i32, i32
  }
  func.func @transform_3(%arg0: i32) -> (i32, i32) {
    %c0_i32 = arith.constant 0 : i32
    %c0_i32_0 = arith.constant 0 : i32
    %c0_i32_1 = arith.constant 0 : i32
    return %c0_i32, %c0_i32_0 : i32, i32
  }
  func.func @transform_4(%arg0: i32) -> (i32, i32) {
    %c0_i32 = arith.constant 0 : i32
    %c0_i32_0 = arith.constant 0 : i32
    %c0_i32_1 = arith.constant 0 : i32
    return %c0_i32, %c0_i32_0 : i32, i32
  }
  func.func @transform_5(%arg0: i32) -> (i32, i32) {
    %c0_i32 = arith.constant 0 : i32
    %c0_i32_0 = arith.constant 0 : i32
    %c0_i32_1 = arith.constant 0 : i32
    return %c0_i32, %c0_i32_0 : i32, i32
  }
  func.func @transform_6(%arg0: i32) -> (i32, i32, i32) {
    %c0_i32 = arith.constant 0 : i32
    %c0_i32_0 = arith.constant 0 : i32
    %c0_i32_1 = arith.constant 0 : i32
    return %arg0, %c0_i32, %c0_i32_0 : i32, i32, i32
  }
}

</mosaic_0001>

<bundles_post_ra>
// kernel: basic_fc_forward_batched.1
= control target key start
LH: loop header
LB: loop body
LE: loop exit
PB: predicated region body
PF: predicated region fallthrough
CT: control target
= control target key end

     0   :  { %11 = vsyncpa [#allocation3], 0  ;;  %s2998_s0 = inlined_call_operand.vmem [shape: f32[4,8,256], index: 0, kind: input, shape index: {}]   ;;  %s2999_s1 = inlined_call_operand.hbm [shape: bf16[256,512], index: 1, kind: input, shape index: {}]   ;;  %s3000_s2 = inlined_call_operand.hbm [shape: bf16[512,256], index: 2, kind: input, shape index: {}]   ;;  %s3001_s3 = inlined_call_operand.vmem [shape: bf16[256,64], index: 3, kind: input, shape index: {}]   ;;  %s3002_s4 = inlined_call_operand.vmem [shape: bf16[64,128], index: 4, kind: input, shape index: {}]   ;;  %s3003_s5 = inlined_call_operand.vmem [shape: f32[2,1024], index: 5, kind: input, shape index: {}]   ;;  %s3004_s6 = inlined_call_operand.vmem [shape: f32[4,8,128], index: 6, kind: output, shape index: {}]  }
   0x1   :  { %12 = vsyncpa [#allocation5], 0  ;;  %s2754_s21 = smov 0  }
   0x2 LB: > { %s191_s24 = sshll.u32 %s2999_s1, 4  ;;  %s2763_s25 = sadd.s32 4294967295, %s2710_s21   ;;  %s2710_s21 = sphi %s2754_s21, %s18_s21   ;;  %s192_s24 = int_to_ptr.hbm [resolvable:$true] %s191_s24 }
   0x3   : > { %p1824_p0 = scmp.ge.s32.totalorder %s2710_s21, 1  ;;  %p180_p1 = scmp.lt.s32.totalorder %s2710_s21, 5 }
   0x4   : > { %p2596_p2 = scmp.eq.s32.totalorder %s2763_s25, 0  ;;  %s2712_s27 = smov [#allocation2]  }
   0x5   : > { %p2768_p3 = pnand %p1824_p0, %p180_p1  ;;  %s193_s28 = sshll.u32 %s2712_s27, 4  ;;  %s194_s28 = int_to_ptr.vmem [resolvable:$true] %s193_s28 }
   0x6   : > { %s205_s7 = sshll.u32 %s3000_s2, 4  ;;  %s2713_s8 = smov [#allocation4]   ;;  %s206_s7 = int_to_ptr.hbm [resolvable:$true] %s205_s7 }
   0x7   : > { %p2589_p4 = pneg %p2768_p3  ;;  %s207_s9 = sshll.u32 %s2713_s8, 4  ;;  %s208_s9 = int_to_ptr.vmem [resolvable:$true] %s207_s9 }
   0x8   : > { %s2714_s10 = smov 256   ;;  %s2715_s11 = smov 16  }
   0x9   : > { %p2590_p5 = pnand %p2596_p2, %p2589_p4  ;;  %s2716_s12 = smov 128  }
   0xa   : > { %s2717_s13 = smov 8   ;;  %240 = sbr.rel (%p2768_p3) target bundleno = 835 (0x343), region = 44 }
   0xb   : > { %2592 = dma.hbm_to_vmem [thread:$0]  (!%p2590_p5), %s192_s24, 8192, %s194_s28, [#allocation3], %s2714_s10, %s2714_s10, %s2715_s11  }
   0xc   : > { %2595 = dma.hbm_to_vmem [thread:$0]  (!%p2590_p5), %s206_s7, 8192, %s208_s9, [#allocation5], %s2716_s12, %s2716_s12, %s2717_s13  }
   0xf   : > { %2701 = dma.done.wait (%p2596_p2), [#allocation3], 8192  }
  0x10   : > { %2703 = vsyncadd (%p2596_p2), [#allocation3], 4294959104 }
  0x11   : > { %2705 = dma.done.wait (%p2596_p2), [#allocation5], 8192  }
  0x12   : > { %2707 = vsyncadd (%p2596_p2), [#allocation5], 4294959104  ;;  %v1948_v0 = vld [vmem:[#allocation2 + $0xe0] sm:$0xf]  ;;  %v2463_v1 = vld [vmem:[#allocation2 + $0xec] sm:$0xf0] }
  0x13   : > { %v2076_v2 = vld [vmem:[#allocation2 + $0x1e0] sm:$0xf]  ;;  %v1949_v3 = vor.u32 %v2463_v1, %v1948_v0  ;;  %v2495_v4 = vld [vmem:[#allocation2 + $0x1ec] sm:$0xf0]  ;;  %v2461_v5 = vld [vmem:[#allocation2 + $0xe4] sm:$0xf] }
  0x14   : > { %v1950_v6 = vld [vmem:[#allocation2 + $0xf0] sm:$0xf0]  ;;  %v2077_v7 = vor.u32 %v2495_v4, %v2076_v2  ;;  %v2493_v9 = vld [vmem:[#allocation2 + $0x1e4] sm:$0xf]  ;;  %v1932_v11 = vld [vmem:[#allocation2 + $0xc0] sm:$0xf] }
  0x15   : > { %v1953_v8 = vor.u32 %v2461_v5, %v1950_v6  ;;  %v2078_v10 = vld [vmem:[#allocation2 + $0x1f0] sm:$0xf0]  ;;  %673 = vmatpush.bf16.msra.mxu0 %v1949_v3  ;;  %v2459_v13 = vld [vmem:[#allocation2 + $0xcc] sm:$0xf0]  ;;  %v2060_v14 = vld [vmem:[#allocation2 + $0x1c0] sm:$0xf] }
  0x16   : > { %v2081_v12 = vor.u32 %v2493_v9, %v2078_v10  ;;  %v2491_v15 = vld [vmem:[#allocation2 + $0x1cc] sm:$0xf0]  ;;  %686 = vmatpush.bf16.msra.mxu1 %v2077_v7  ;;  %v1933_v16 = vor.u32 %v2459_v13, %v1932_v11  ;;  %v2457_v18 = vld [vmem:[#allocation2 + $0xc4] sm:$0xf]  ;;  %v1934_v19 = vld [vmem:[#allocation2 + $0xd0] sm:$0xf0] }
  0x17   : > { %699 = vmatpush.bf16.msra.mxu2 %v1953_v8  ;;  %v2061_v17 = vor.u32 %v2491_v15, %v2060_v14  ;;  %v2489_v20 = vld [vmem:[#allocation2 + $0x1c4] sm:$0xf]  ;;  %v1937_v21 = vor.u32 %v2457_v18, %v1934_v19  ;;  %v2062_v22 = vld [vmem:[#allocation2 + $0x1d0] sm:$0xf0]  ;;  %v1916_v23 = vld [vmem:[#allocation2 + $0xa0] sm:$0xf] }
  0x18   : > { %712 = vmatpush.bf16.msra.mxu3 %v2081_v12  ;;  %v2455_v24 = vld [vmem:[#allocation2 + $0xac] sm:$0xf0]  ;;  %v2065_v25 = vor.u32 %v2489_v20, %v2062_v22  ;;  %v2044_v26 = vld [vmem:[#allocation2 + $0x1a0] sm:$0xf]  ;;  %v2453_v28 = vld [vmem:[#allocation2 + $0xa4] sm:$0xf] }
  0x19   : > { %v2487_v27 = vld [vmem:[#allocation2 + $0x1ac] sm:$0xf0]  ;;  %674 = vmatpush.bf16.msra.mxu0 %v1933_v16  ;;  %v1917_v29 = vor.u32 %v2455_v24, %v1916_v23  ;;  %v1918_v30 = vld [vmem:[#allocation2 + $0xb0] sm:$0xf0]  ;;  %v2485_v31 = vld [vmem:[#allocation2 + $0x1a4] sm:$0xf] }
  0x1a   : > { %v2046_v32 = vld [vmem:[#allocation2 + $0x1b0] sm:$0xf0]  ;;  %687 = vmatpush.bf16.msra.mxu1 %v2061_v17  ;;  %v2045_v33 = vor.u32 %v2487_v27, %v2044_v26  ;;  %v1921_v34 = vor.u32 %v2453_v28, %v1918_v30  ;;  %v1900_v35 = vld [vmem:[#allocation2 + $0x80] sm:$0xf]  ;;  %v2451_v36 = vld [vmem:[#allocation2 + $0x8c] sm:$0xf0] }
  0x1b   : > { %700 = vmatpush.bf16.msra.mxu2 %v1937_v21  ;;  %v2028_v37 = vld [vmem:[#allocation2 + $0x180] sm:$0xf]  ;;  %v2049_v38 = vor.u32 %v2485_v31, %v2046_v32  ;;  %v2483_v39 = vld [vmem:[#allocation2 + $0x18c] sm:$0xf0]  ;;  %v2449_v40 = vld [vmem:[#allocation2 + $0x84] sm:$0xf]  ;;  %v1901_v44 = vor.u32 %v2451_v36, %v1900_v35 }
  0x1c   : > { %713 = vmatpush.bf16.msra.mxu3 %v2065_v25  ;;  %v1902_v41 = vld [vmem:[#allocation2 + $0x90] sm:$0xf0]  ;;  %v2481_v42 = vld [vmem:[#allocation2 + $0x184] sm:$0xf]  ;;  %v2029_v45 = vor.u32 %v2483_v39, %v2028_v37  ;;  %v1884_v47 = vld [vmem:[#allocation2 + $0x60] sm:$0xf] }
  0x1d   : > { %v2030_v43 = vld [vmem:[#allocation2 + $0x190] sm:$0xf0]  ;;  %675 = vmatpush.bf16.msra.mxu0 %v1917_v29  ;;  %v1905_v46 = vor.u32 %v2449_v40, %v1902_v41  ;;  %v2447_v48 = vld [vmem:[#allocation2 + $0x6c] sm:$0xf0]  ;;  %v2012_v49 = vld [vmem:[#allocation2 + $0x160] sm:$0xf] }
  0x1e   : > { %688 = vmatpush.bf16.msra.mxu1 %v2045_v33  ;;  %v2033_v50 = vor.u32 %v2481_v42, %v2030_v43  ;;  %v2479_v51 = vld [vmem:[#allocation2 + $0x16c] sm:$0xf0]  ;;  %v2445_v52 = vld [vmem:[#allocation2 + $0x64] sm:$0xf]  ;;  %v1886_v53 = vld [vmem:[#allocation2 + $0x70] sm:$0xf0]  ;;  %v1885_v56 = vor.u32 %v2447_v48, %v1884_v47 }
  0x1f   : > { %701 = vmatpush.bf16.msra.mxu2 %v1921_v34  ;;  %v2477_v54 = vld [vmem:[#allocation2 + $0x164] sm:$0xf]  ;;  %v2014_v55 = vld [vmem:[#allocation2 + $0x170] sm:$0xf0]  ;;  %p275_p6 = scmp.lt.s32.totalorder %s2763_s25, 3  ;;  %v2013_v57 = vor.u32 %v2479_v51, %v2012_v49  ;;  %v1889_v58 = vor.u32 %v2445_v52, %v1886_v53 }
  0x20   : > { %714 = vmatpush.bf16.msra.mxu3 %v2049_v38  ;;  %v1868_v59 = vld [vmem:[#allocation2 + $0x40] sm:$0xf]  ;;  %v2443_v60 = vld [vmem:[#allocation2 + $0x4c] sm:$0xf0]  ;;  %v2017_v62 = vor.u32 %v2477_v54, %v2014_v55  ;;  %v2441_v0 = vld [vmem:[#allocation2 + $0x44] sm:$0xf] }
  0x21   : > { %676 = vmatpush.bf16.msra.mxu0 %v1901_v44  ;;  %v1996_v61 = vld [vmem:[#allocation2 + $0x140] sm:$0xf]  ;;  %v2475_v63 = vld [vmem:[#allocation2 + $0x14c] sm:$0xf0]  ;;  %v1870_v1 = vld [vmem:[#allocation2 + $0x50] sm:$0xf0]  ;;  %v1869_v4 = vor.u32 %v2443_v60, %v1868_v59 }
  0x22   : > { %689 = vmatpush.bf16.msra.mxu1 %v2029_v45  ;;  %v2473_v2 = vld [vmem:[#allocation2 + $0x144] sm:$0xf]  ;;  %v1998_v3 = vld [vmem:[#allocation2 + $0x150] sm:$0xf0]  ;;  %s3007_s25 = smov (!%p275_p6, %s2763_s25), 3  ;;  %v1997_v5 = vor.u32 %v2475_v63, %v1996_v61  ;;  %v1873_v6 = vor.u32 %v2441_v0, %v1870_v1 }
  0x23   : > { %702 = vmatpush.bf16.msra.mxu2 %v1905_v46  ;;  %v1852_v7 = vld [vmem:[#allocation2 + $0x20] sm:$0xf]  ;;  %v2439_v8 = vld [vmem:[#allocation2 + $0x2c] sm:$0xf0]  ;;  %v2001_v10 = vor.u32 %v2473_v2, %v1998_v3  ;;  %v2437_v12 = vld [vmem:[#allocation2 + $0x24] sm:$0xf] }
  0x24   : > { %715 = vmatpush.bf16.msra.mxu3 %v2033_v50  ;;  %v1980_v9 = vld [vmem:[#allocation2 + $0x120] sm:$0xf]  ;;  %v2471_v11 = vld [vmem:[#allocation2 + $0x12c] sm:$0xf0]  ;;  %v1854_v13 = vld [vmem:[#allocation2 + $0x30] sm:$0xf0]  ;;  %v1853_v16 = vor.u32 %v2439_v8, %v1852_v7 }
  0x25   : > { %677 = vmatpush.bf16.msra.mxu0 %v1885_v56  ;;  %v2469_v14 = vld [vmem:[#allocation2 + $0x124] sm:$0xf]  ;;  %v1982_v15 = vld [vmem:[#allocation2 + $0x130] sm:$0xf0]  ;;  %s2432_s14 = sshll.u32 %s3007_s25, 4  ;;  %v1981_v19 = vor.u32 %v2471_v11, %v1980_v9  ;;  %v1857_v20 = vor.u32 %v2437_v12, %v1854_v13  ;;  %s1833_s30 = sshll.u32 %s3007_s25, 3 }
  0x26   : > { %690 = vmatpush.bf16.msra.mxu1 %v2013_v57  ;;  %v1836_v17 = vld [vmem:[#allocation2] sm:$0xf]  ;;  %v2435_v18 = vld [vmem:[#allocation2 + $0xc] sm:$0xf0]  ;;  %v2433_v23 = vld [vmem:[#allocation2 + $0x4] sm:$0xf]  ;;  %v1985_v24 = vor.u32 %v2469_v14, %v1982_v15  ;;  %s279_s17 = scalar_lea.vmem %s2998_s0, %s2432_s14  ;;  %s283_s9 = scalar_lea.vmem %s3004_s6, %s1833_s30 }
  0x27   : > { %703 = vmatpush.bf16.msra.mxu2 %v1889_v58  ;;  %v1964_v21 = vld [vmem:[#allocation2 + $0x100] sm:$0xf]  ;;  %v2467_v22 = vld [vmem:[#allocation2 + $0x10c] sm:$0xf0]  ;;  %v1838_v25 = vld [vmem:[#allocation2 + $0x10] sm:$0xf0]  ;;  %v1837_v31 = vor.u32 %v2435_v18, %v1836_v17 }
  0x28   : > { %716 = vmatpush.bf16.msra.mxu3 %v2017_v62  ;;  %v2465_v26 = vld [vmem:[#allocation2 + $0x104] sm:$0xf]  ;;  %v1966_v27 = vld [vmem:[#allocation2 + $0x110] sm:$0xf0]  ;;  %v1956_v28 = vld [vmem:[#allocation2 + $0xe8] sm:$0xf]  ;;  %v1965_v35 = vor.u32 %v2467_v22, %v1964_v21  ;;  %v1841_v36 = vor.u32 %v2433_v23, %v1838_v25 }
  0x29   : > { %678 = vmatpush.bf16.msra.mxu0 %v1869_v4  ;;  %v2464_v29 = vld [vmem:[#allocation2 + $0xf4] sm:$0xf0]  ;;  %v2084_v30 = vld [vmem:[#allocation2 + $0x1e8] sm:$0xf]  ;;  %v2462_v33 = vld [vmem:[#allocation2 + $0xec] sm:$0xf]  ;;  %v1969_v40 = vor.u32 %v2465_v26, %v1966_v27 }
  0x2a   : > { %691 = vmatpush.bf16.msra.mxu1 %v1997_v5  ;;  %v2496_v32 = vld [vmem:[#allocation2 + $0x1f4] sm:$0xf0]  ;;  %v1958_v34 = vld [vmem:[#allocation2 + $0xf8] sm:$0xf0]  ;;  %v2494_v37 = vld [vmem:[#allocation2 + $0x1ec] sm:$0xf]  ;;  %v1957_v41 = vor.u32 %v2464_v29, %v1956_v28 }
  0x2b   : > { %704 = vmatpush.bf16.msra.mxu2 %v1873_v6  ;;  %v2086_v38 = vld [vmem:[#allocation2 + $0x1f8] sm:$0xf0]  ;;  %v285_v39 = vld [vmem:[%s279_s17] sm:$0xff]  ;;  %v286_v42 = vld [vmem:[%s279_s17 + $0x8] sm:$0xff]  ;;  %v2085_v43 = vor.u32 %v2496_v32, %v2084_v30  ;;  %v1961_v44 = vor.u32 %v2462_v33, %v1958_v34 }
  0x2c   : > { %717 = vmatpush.bf16.msra.mxu3 %v2001_v10  ;;  %v1940_v45 = vld [vmem:[#allocation2 + $0xc8] sm:$0xf]  ;;  %v2460_v46 = vld [vmem:[#allocation2 + $0xd4] sm:$0xf0]  ;;  %v2089_v48 = vor.u32 %v2494_v37, %v2086_v38  ;;  %v2799_v49 = vpack.c.bf16 %v285_v39, %v285_v39  ;;  %v2458_v51 = vld [vmem:[#allocation2 + $0xcc] sm:$0xf]  ;;  %v2801_v53 = vpack.c.bf16 %v286_v42, %v286_v42 }
  0x2d   : > { %679 = vmatpush.bf16.msra.mxu0 %v1853_v16  ;;  %v2068_v47 = vld [vmem:[#allocation2 + $0x1c8] sm:$0xf]  ;;  %v2492_v50 = vld [vmem:[#allocation2 + $0x1d4] sm:$0xf0]  ;;  %v1942_v52 = vld [vmem:[#allocation2 + $0xd8] sm:$0xf0]  ;;  %v1941_v56 = vor.u32 %v2460_v46, %v1940_v45 }
  0x2e   : > { %692 = vmatpush.bf16.msra.mxu1 %v1981_v19  ;;  %v2490_v54 = vld [vmem:[#allocation2 + $0x1cc] sm:$0xf]  ;;  %v2070_v55 = vld [vmem:[#allocation2 + $0x1d8] sm:$0xf0]  ;;  %v2069_v57 = vor.u32 %v2492_v50, %v2068_v47  ;;  %v1945_v58 = vor.u32 %v2458_v51, %v1942_v52  ;;  %v1924_v59 = vld [vmem:[#allocation2 + $0xa8] sm:$0xf] }
  0x2f   : > { %705 = vmatpush.bf16.msra.mxu2 %v1857_v20  ;;  %v2456_v60 = vld [vmem:[#allocation2 + $0xb4] sm:$0xf0]  ;;  %v2052_v61 = vld [vmem:[#allocation2 + $0x1a8] sm:$0xf]  ;;  %v2073_v62 = vor.u32 %v2490_v54, %v2070_v55  ;;  %v2454_v0 = vld [vmem:[#allocation2 + $0xac] sm:$0xf] }
  0x30   : > { %718 = vmatpush.bf16.msra.mxu3 %v1985_v24  ;;  %v2488_v63 = vld [vmem:[#allocation2 + $0x1b4] sm:$0xf0]  ;;  %v1926_v1 = vld [vmem:[#allocation2 + $0xb8] sm:$0xf0]  ;;  %v2486_v2 = vld [vmem:[#allocation2 + $0x1ac] sm:$0xf]  ;;  %v1925_v4 = vor.u32 %v2456_v60, %v1924_v59 }
  0x31   : > { %680 = vmatpush.bf16.msra.mxu0 %v1837_v31  ;;  %v2054_v3 = vld [vmem:[#allocation2 + $0x1b8] sm:$0xf0]  ;;  %v2053_v5 = vor.u32 %v2488_v63, %v2052_v61  ;;  %v1929_v6 = vor.u32 %v2454_v0, %v1926_v1  ;;  %v1908_v7 = vld [vmem:[#allocation2 + $0x88] sm:$0xf]  ;;  %v2452_v8 = vld [vmem:[#allocation2 + $0x94] sm:$0xf0] }
  0x32   : > { %693 = vmatpush.bf16.msra.mxu1 %v1965_v35  ;;  %v2036_v9 = vld [vmem:[#allocation2 + $0x188] sm:$0xf]  ;;  %v2057_v10 = vor.u32 %v2486_v2, %v2054_v3  ;;  %v2484_v11 = vld [vmem:[#allocation2 + $0x194] sm:$0xf0]  ;;  %v2450_v12 = vld [vmem:[#allocation2 + $0x8c] sm:$0xf]  ;;  %v1909_v16 = vor.u32 %v2452_v8, %v1908_v7 }
  0x33   : > { %706 = vmatpush.bf16.msra.mxu2 %v1841_v36  ;;  %v1910_v13 = vld [vmem:[#allocation2 + $0x98] sm:$0xf0]  ;;  %v2482_v14 = vld [vmem:[#allocation2 + $0x18c] sm:$0xf]  ;;  %v1892_v17 = vld [vmem:[#allocation2 + $0x68] sm:$0xf]  ;;  %v2037_v19 = vor.u32 %v2484_v11, %v2036_v9 }
  0x34   : > { %719 = vmatpush.bf16.msra.mxu3 %v1969_v40  ;;  %681 = vmatmul.bf16.vlgmr.msra.gmra.mxu0 %v2799_v49  ;;  %v2038_v15 = vld [vmem:[#allocation2 + $0x198] sm:$0xf0]  ;;  %v2448_v18 = vld [vmem:[#allocation2 + $0x74] sm:$0xf0]  ;;  %v1913_v20 = vor.u32 %v2450_v12, %v1910_v13  ;;  %v2020_v21 = vld [vmem:[#allocation2 + $0x168] sm:$0xf] }
  0x35   : > { %725 = vmatpush.bf16.msrb.mxu0 %v1957_v41  ;;  %694 = vmatmul.bf16.vlgmr.msra.gmra.mxu1 %v2801_v53  ;;  %v2480_v22 = vld [vmem:[#allocation2 + $0x174] sm:$0xf0]  ;;  %v2446_v23 = vld [vmem:[#allocation2 + $0x6c] sm:$0xf]  ;;  %v2041_v24 = vor.u32 %v2482_v14, %v2038_v15  ;;  %v1894_v25 = vld [vmem:[#allocation2 + $0x78] sm:$0xf0]  ;;  %v1893_v28 = vor.u32 %v2448_v18, %v1892_v17 }
  0x36   : > { %738 = vmatpush.bf16.msrb.mxu1 %v2085_v43  ;;  %707 = vmatmul.bf16.vlgmr.msra.gmra.mxu2 %v2799_v49  ;;  %v2478_v26 = vld [vmem:[#allocation2 + $0x16c] sm:$0xf]  ;;  %v2022_v27 = vld [vmem:[#allocation2 + $0x178] sm:$0xf0]  ;;  %v2021_v29 = vor.u32 %v2480_v22, %v2020_v21  ;;  %v1897_v30 = vor.u32 %v2446_v23, %v1894_v25  ;;  %v1876_v31 = vld [vmem:[#allocation2 + $0x48] sm:$0xf] }
  0x37   : > { %751 = vmatpush.bf16.msrb.mxu2 %v1961_v44  ;;  %720 = vmatmul.bf16.vlgmr.msra.gmra.mxu3 %v2801_v53  ;;  %v2444_v32 = vld [vmem:[#allocation2 + $0x54] sm:$0xf0]  ;;  %v2004_v33 = vld [vmem:[#allocation2 + $0x148] sm:$0xf]  ;;  %v2025_v34 = vor.u32 %v2478_v26, %v2022_v27  ;;  %v2442_v36 = vld [vmem:[#allocation2 + $0x4c] sm:$0xf] }
  0x38   : > { %764 = vmatpush.bf16.msrb.mxu3 %v2089_v48  ;;  %v2476_v35 = vld [vmem:[#allocation2 + $0x154] sm:$0xf0]  ;;  %v1878_v37 = vld [vmem:[#allocation2 + $0x58] sm:$0xf0]  ;;  %v2474_v38 = vld [vmem:[#allocation2 + $0x14c] sm:$0xf]  ;;  %v1877_v40 = vor.u32 %v2444_v32, %v1876_v31 }
  0x39   : > { %726 = vmatpush.bf16.msrb.mxu0 %v1941_v56  ;;  %v2006_v39 = vld [vmem:[#allocation2 + $0x158] sm:$0xf0]  ;;  %v2005_v41 = vor.u32 %v2476_v35, %v2004_v33  ;;  %v1881_v42 = vor.u32 %v2442_v36, %v1878_v37  ;;  %v1860_v43 = vld [vmem:[#allocation2 + $0x28] sm:$0xf]  ;;  %v2440_v44 = vld [vmem:[#allocation2 + $0x34] sm:$0xf0] }
  0x3a   : > { %739 = vmatpush.bf16.msrb.mxu1 %v2069_v57  ;;  %v1988_v45 = vld [vmem:[#allocation2 + $0x128] sm:$0xf]  ;;  %v2009_v46 = vor.u32 %v2474_v38, %v2006_v39  ;;  %v2472_v47 = vld [vmem:[#allocation2 + $0x134] sm:$0xf0]  ;;  %v2438_v48 = vld [vmem:[#allocation2 + $0x2c] sm:$0xf]  ;;  %v1861_v54 = vor.u32 %v2440_v44, %v1860_v43 }
  0x3b   : > { %752 = vmatpush.bf16.msrb.mxu2 %v1945_v58  ;;  %v1862_v50 = vld [vmem:[#allocation2 + $0x38] sm:$0xf0]  ;;  %v2470_v51 = vld [vmem:[#allocation2 + $0x12c] sm:$0xf]  ;;  %v1989_v55 = vor.u32 %v2472_v47, %v1988_v45  ;;  %v1844_v57 = vld [vmem:[#allocation2 + $0x8] sm:$0xf] }
  0x3c   : > { %765 = vmatpush.bf16.msrb.mxu3 %v2073_v62  ;;  %v1990_v52 = vld [vmem:[#allocation2 + $0x138] sm:$0xf0]  ;;  %v1865_v56 = vor.u32 %v2438_v48, %v1862_v50  ;;  %v2436_v58 = vld [vmem:[#allocation2 + $0x14] sm:$0xf0]  ;;  %v1972_v59 = vld [vmem:[#allocation2 + $0x108] sm:$0xf] }
  0x3d   : > { %727 = vmatpush.bf16.msrb.mxu0 %v1925_v4  ;;  %v1993_v60 = vor.u32 %v2470_v51, %v1990_v52  ;;  %v2468_v61 = vld [vmem:[#allocation2 + $0x114] sm:$0xf0]  ;;  %v2434_v62 = vld [vmem:[#allocation2 + $0xc] sm:$0xf]  ;;  %v1846_v63 = vld [vmem:[#allocation2 + $0x18] sm:$0xf0]  ;;  %v1845_v2 = vor.u32 %v2436_v58, %v1844_v57 }
  0x3e   : > { %740 = vmatpush.bf16.msrb.mxu1 %v2053_v5  ;;  %v2466_v0 = vld [vmem:[#allocation2 + $0x10c] sm:$0xf]  ;;  %v1974_v1 = vld [vmem:[#allocation2 + $0x118] sm:$0xf0]  ;;  %v1973_v3 = vor.u32 %v2468_v61, %v1972_v59  ;;  %v1849_v4 = vor.u32 %v2434_v62, %v1846_v63  ;;  %v2149_v7 = vld [vmem:[#allocation4 + $0x70] sm:$0xf] }
  0x3f   : > { %753 = vmatpush.bf16.msrb.mxu2 %v1929_v6  ;;  %v1977_v5 = vor.u32 %v2466_v0, %v1974_v1  ;;  %v2718_v6 = vmov 8.0   ;;  %v2512_v8 = vld [vmem:[#allocation4 + $0x74] sm:$0xf0]  ;;  %v2510_v11 = vld [vmem:[#allocation4 + $0x64] sm:$0xf0] }
  0x40   : > { %766 = vmatpush.bf16.msrb.mxu3 %v2057_v10  ;;  %2618 = vrcp.f32 %v2718_v6  ;;  %v2150_v9 = vor.u32 %v2512_v8, %v2149_v7  ;;  %v2141_v10 = vld [vmem:[#allocation4 + $0x60] sm:$0xf]  ;;  %v2213_v14 = vld [vmem:[#allocation4 + $0xf0] sm:$0xf]  ;;  %v2528_v15 = vld [vmem:[#allocation4 + $0xf4] sm:$0xf0] }
  0x41   : > { %728 = vmatpush.bf16.msrb.mxu0 %v1909_v16  ;;  %v2142_v12 = vor.u32 %v2510_v11, %v2141_v10  ;;  %v2214_v16 = vor.u32 %v2528_v15, %v2213_v14  ;;  %v2133_v17 = vld [vmem:[#allocation4 + $0x50] sm:$0xf]  ;;  %v2508_v18 = vld [vmem:[#allocation4 + $0x54] sm:$0xf0]  ;;  %v2125_v23 = vld [vmem:[#allocation4 + $0x40] sm:$0xf] }
  0x42   : > { %741 = vmatpush.bf16.msrb.mxu1 %v2037_v19  ;;  %v2117_v33 = vld [vmem:[#allocation4 + $0x30] sm:$0xf]  ;;  %v2189_v38 = vld [vmem:[#allocation4 + $0xc0] sm:$0xf]  ;;  %v2522_v39 = vld [vmem:[#allocation4 + $0xc4] sm:$0xf0] }
  0x43   : > { %754 = vmatpush.bf16.msrb.mxu2 %v1913_v20  ;;  %v2526_v20 = vld [vmem:[#allocation4 + $0xe4] sm:$0xf0]  ;;  %v2109_v45 = vld [vmem:[#allocation4 + $0x20] sm:$0xf]  ;;  %v2101_v59 = vld [vmem:[#allocation4 + $0x10] sm:$0xf] }
  0x44   : > { %767 = vmatpush.bf16.msrb.mxu3 %v2041_v24  ;;  %v2506_v24 = vld [vmem:[#allocation4 + $0x44] sm:$0xf0]  ;;  %v2173_v1 = vld [vmem:[#allocation4 + $0xa0] sm:$0xf]  ;;  %v2511_v14 = vld [vmem:[#allocation4 + $0x74] sm:$0xf] }
  0x45   : > { %729 = vmatpush.bf16.msrb.mxu0 %v1893_v28  ;;  %v2126_v27 = vor.u32 %v2506_v24, %v2125_v23  ;;  %v2093_v8 = vld [vmem:[#allocation4] sm:$0xf]  ;;  %v2542_v24 = vld [vmem:[#allocation4 + $0x164] sm:$0xf0] }
  0x46   : > { %742 = vmatpush.bf16.msrb.mxu1 %v2021_v29  ;;  %v2619_v13 = vpop.eup %2618  ;;  %v2197_v29 = vld [vmem:[#allocation4 + $0xd0] sm:$0xf]  ;;  %v2269_v23 = vld [vmem:[#allocation4 + $0x160] sm:$0xf] }
  0x47   : > { %755 = vmatpush.bf16.msrb.mxu2 %v1897_v30  ;;  %v805_v19 = vmul.f32 8.0, %v2619_v13  ;;  %v2524_v30 = vld [vmem:[#allocation4 + $0xd4] sm:$0xf0]  ;;  %vm809_vm0 = vweird.f32 %v2619_v13 }
  0x48   : > { %768 = vmatpush.bf16.msrb.mxu3 %v2025_v34  ;;  %v2198_v31 = vor.u32 %v2524_v30, %v2197_v29  ;;  %v2504_v34 = vld [vmem:[#allocation4 + $0x34] sm:$0xf0]  ;;  %v2157_v29 = vld [vmem:[#allocation4 + $0x80] sm:$0xf] }
  0x49   : > { %730 = vmatpush.bf16.msrb.mxu0 %v1877_v40  ;;  %v806_v26 = vsub.f32 1.0, %v805_v19  ;;  %v2118_v36 = vor.u32 %v2504_v34, %v2117_v33  ;;  %v2516_v19 = vld [vmem:[#allocation4 + $0x94] sm:$0xf0]  ;;  %v2341_v33 = vld [vmem:[#allocation4 + $0x1f0] sm:$0xf] }
  0x4a   : > { %743 = vmatpush.bf16.msrb.mxu1 %v2005_v41  ;;  %v2190_v41 = vor.u32 %v2522_v39, %v2189_v38  ;;  %v2560_v34 = vld [vmem:[#allocation4 + $0x1f4] sm:$0xf0]  ;;  %v2527_v38 = vld [vmem:[#allocation4 + $0xf4] sm:$0xf]  ;;  %v2215_v39 = vld [vmem:[#allocation4 + $0xf8] sm:$0xf0] }
  0x4b   : > { %756 = vmatpush.bf16.msrb.mxu2 %v1881_v42  ;;  %v807_v35 = vmul.f32 %v2619_v13, %v806_v26 }
  0x4c   : > { %769 = vmatpush.bf16.msrb.mxu3 %v2009_v46  ;;  %v2502_v46 = vld [vmem:[#allocation4 + $0x24] sm:$0xf0] }
  0x4d   : > { %731 = vmatpush.bf16.msrb.mxu0 %v1861_v54  ;;  %v808_v47 = vadd.f32 %v2619_v13, %v807_v35  ;;  %v2110_v51 = vor.u32 %v2502_v46, %v2109_v45  ;;  %v2181_v54 = vld [vmem:[#allocation4 + $0xb0] sm:$0xf] }
  0x4e   : > { %744 = vmatpush.bf16.msrb.mxu1 %v1989_v55  ;;  %v2520_v55 = vld [vmem:[#allocation4 + $0xb4] sm:$0xf0] }
  0x4f   : > { %757 = vmatpush.bf16.msrb.mxu2 %v1865_v56  ;;  %v2182_v57 = vor.u32 %v2520_v55, %v2181_v54  ;;  %v2814_v61 = vsel %vm809_vm0, %v2619_v13, %v808_v47  ;;  %v2544_v13 = vld [vmem:[#allocation4 + $0x174] sm:$0xf0]  ;;  %v2135_v47 = vld [vmem:[#allocation4 + $0x58] sm:$0xf0]  ;;  %v2558_v54 = vld [vmem:[#allocation4 + $0x1e4] sm:$0xf0] }
  0x50   : > { %770 = vmatpush.bf16.msrb.mxu3 %v1993_v60  ;;  %v2500_v60 = vld [vmem:[#allocation4 + $0x14] sm:$0xf0]  ;;  %v2525_v55 = vld [vmem:[#allocation4 + $0xe4] sm:$0xf] }
  0x51   : > { %732 = vmatpush.bf16.msrb.mxu0 %v1845_v2  ;;  %v2102_v63 = vor.u32 %v2500_v60, %v2101_v59  ;;  %v2518_v2 = vld [vmem:[#allocation4 + $0xa4] sm:$0xf0] }
  0x52   : > { %745 = vmatpush.bf16.msrb.mxu1 %v1973_v3 }
  0x53   : > { %758 = vmatpush.bf16.msrb.mxu2 %v1849_v4 }
  0x54   : > { %771 = vmatpush.bf16.msrb.mxu3 %v1977_v5  ;;  %733 = vmatmul.bf16.vlgmr.msrb.gmra.mxu0 %v2799_v49  ;;  %v2174_v5 = vor.u32 %v2518_v2, %v2173_v1 }
  0x55   : > { %746 = vmatmul.bf16.vlgmr.msrb.gmra.mxu1 %v2801_v53  ;;  %1317 = vmatpush.bf16.msra.mxu0 %v2150_v9  ;;  %v2498_v9 = vld [vmem:[#allocation4 + $0x4] sm:$0xf0] }
  0x56   : > { %759 = vmatmul.bf16.vlgmr.msrb.gmra.mxu2 %v2799_v49  ;;  %1330 = vmatpush.bf16.msra.mxu1 %v2214_v16  ;;  %v2134_v49 = vor.u32 %v2508_v18, %v2133_v17  ;;  %v2094_v11 = vor.u32 %v2498_v9, %v2093_v8  ;;  %v2151_v17 = vld [vmem:[#allocation4 + $0x78] sm:$0xf0]  ;;  %v2165_v18 = vld [vmem:[#allocation4 + $0x90] sm:$0xf]  ;;  %v2556_v9 = vld [vmem:[#allocation4 + $0x1d4] sm:$0xf0] }
  0x57   : > { %772 = vmatmul.bf16.vlgmr.msrb.gmra.mxu3 %v2801_v53  ;;  %v2205_v53 = vld [vmem:[#allocation4 + $0xe0] sm:$0xf]  ;;  %v2325_v8 = vld [vmem:[#allocation4 + $0x1d0] sm:$0xf] }
  0x58   : > { %v2206_v21 = vor.u32 %v2526_v20, %v2205_v53  ;;  %v2154_v53 = vor.u32 %v2511_v14, %v2151_v17  ;;  %v2166_v20 = vor.u32 %v2516_v19, %v2165_v18  ;;  %v2245_v18 = vld [vmem:[#allocation4 + $0x130] sm:$0xf]  ;;  %v2536_v19 = vld [vmem:[#allocation4 + $0x134] sm:$0xf0] }
  0x59   : > { %1318 = vmatpush.bf16.msra.mxu0 %v2142_v12  ;;  %v2277_v12 = vld [vmem:[#allocation4 + $0x170] sm:$0xf] }
  0x5a   : > { %1331 = vmatpush.bf16.msra.mxu1 %v2206_v21  ;;  %v2278_v16 = vor.u32 %v2544_v13, %v2277_v12  ;;  %v2523_v12 = vld [vmem:[#allocation4 + $0xd4] sm:$0xf]  ;;  %v2199_v13 = vld [vmem:[#allocation4 + $0xd8] sm:$0xf0] }
  0x5b   : > { %v2202_v17 = vor.u32 %v2523_v12, %v2199_v13  ;;  %v2517_v12 = vld [vmem:[#allocation4 + $0xa4] sm:$0xf]  ;;  %v2175_v13 = vld [vmem:[#allocation4 + $0xa8] sm:$0xf0] }
  0x5c   : > { %1343 = vmatpush.bf16.msra.mxu2 %v2278_v16 }
  0x5d   : > { %1319 = vmatpush.bf16.msra.mxu0 %v2134_v49 }
  0x5e   : > { %1332 = vmatpush.bf16.msra.mxu1 %v2198_v31 }
  0x61   : > { %1320 = vmatpush.bf16.msra.mxu0 %v2126_v27  ;;  %v2270_v27 = vor.u32 %v2542_v24, %v2269_v23 }
  0x62   : > { %1333 = vmatpush.bf16.msra.mxu1 %v2190_v41  ;;  %v2218_v41 = vor.u32 %v2527_v38, %v2215_v39  ;;  %v2534_v38 = vld [vmem:[#allocation4 + $0x124] sm:$0xf0] }
  0x63   : > { %1344 = vmatpush.bf16.msra.mxu2 %v2270_v27  ;;  %v2521_v27 = vld [vmem:[#allocation4 + $0xc4] sm:$0xf] }
  0x65   : > { %1321 = vmatpush.bf16.msra.mxu0 %v2118_v36 }
  0x66   : > { %1334 = vmatpush.bf16.msra.mxu1 %v2182_v57  ;;  %v2207_v57 = vld [vmem:[#allocation4 + $0xe8] sm:$0xf0] }
  0x67   : > { %v2210_v60 = vor.u32 %v2525_v55, %v2207_v57 }
  0x69   : > { %1322 = vmatpush.bf16.msra.mxu0 %v2110_v51 }
  0x6a   : > { %1335 = vmatpush.bf16.msra.mxu1 %v2174_v5 }
  0x6d   : > { %1323 = vmatpush.bf16.msra.mxu0 %v2102_v63  ;;  %v2538_v63 = vld [vmem:[#allocation4 + $0x144] sm:$0xf0] }
  0x6e   : > { %1336 = vmatpush.bf16.msra.mxu1 %v2166_v20  ;;  %v2503_v20 = vld [vmem:[#allocation4 + $0x34] sm:$0xf] }
  0x71   : > { %1324 = vmatpush.bf16.msra.mxu0 %v2094_v11  ;;  %v2326_v11 = vor.u32 %v2556_v9, %v2325_v8 }
  0x75   : > { %1369 = vmatpush.bf16.msrb.mxu0 %v2154_v53  ;;  %v2246_v53 = vor.u32 %v2536_v19, %v2245_v18  ;;  %v2530_v18 = vld [vmem:[#allocation4 + $0x104] sm:$0xf0]  ;;  %v2497_v19 = vld [vmem:[#allocation4 + $0x4] sm:$0xf] }
  0xb1   : > { %v682_v22 = vpop.f32.mrf.mxu0 }
  0xb2   : > { %v695_v25 = vpop.f32.mrf.mxu1 }
  0xb3   : > { %v696_v28 = vadd.f32 %v695_v25, %v682_v22  ;;  %v2509_v25 = vld [vmem:[#allocation4 + $0x64] sm:$0xf] }
  0xb5   : > { %v780_v32 = vrot.slane %v696_v28, 4 }
  0xb7   : > { %v781_v37 = vadd.f32 %v780_v32, %v696_v28  ;;  %v2514_v32 = vld [vmem:[#allocation4 + $0x84] sm:$0xf0] }
  0xb8   : > { %v2158_v36 = vor.u32 %v2514_v32, %v2157_v29 }
  0xb9   : > { %v708_v40 = vpop.f32.mrf.mxu2  ;;  %v782_v42 = vrot.slane %v781_v37, 2  ;;  %v684_v44 = vpop.f32.mrf.mxu0 }
  0xba   : > { %v721_v43 = vpop.f32.mrf.mxu3  ;;  %v697_v50 = vpop.f32.mrf.mxu1  ;;  %v2507_v44 = vld [vmem:[#allocation4 + $0x54] sm:$0xf]  ;;  %1337 = vmatpush.bf16.msra.mxu1 %v2158_v36 }
  0xbb   : > { %v2811_v48 = vadd.f32 %v721_v43, %v708_v40  ;;  %v783_v52 = vadd.f32 %v782_v42, %v781_v37  ;;  %v2342_v37 = vor.u32 %v2560_v34, %v2341_v33  ;;  %v2261_v42 = vld [vmem:[#allocation4 + $0x150] sm:$0xf]  ;;  %v2540_v43 = vld [vmem:[#allocation4 + $0x154] sm:$0xf0]  ;;  %v2138_v51 = vor.u32 %v2507_v44, %v2135_v47  ;;  %v2111_v44 = vld [vmem:[#allocation4 + $0x28] sm:$0xf0] }
  0xbc   : > { %v2262_v46 = vor.u32 %v2540_v43, %v2261_v42  ;;  %v2501_v43 = vld [vmem:[#allocation4 + $0x24] sm:$0xf] }
  0xbd   : > { %v786_v56 = vrot.slane %v2811_v48, 4  ;;  %v784_v58 = vrot.slane %v783_v52, 1  ;;  %1356 = vmatpush.bf16.msra.mxu3 %v2342_v37  ;;  %v2237_v37 = vld [vmem:[#allocation4 + $0x120] sm:$0xf]  ;;  %v2114_v47 = vor.u32 %v2501_v43, %v2111_v44  ;;  %v2271_v43 = vld [vmem:[#allocation4 + $0x168] sm:$0xf0] }
  0xbe   : > { %1382 = vmatpush.bf16.msrb.mxu1 %v2218_v41  ;;  %1345 = vmatpush.bf16.msra.mxu2 %v2262_v46  ;;  %v2238_v42 = vor.u32 %v2534_v38, %v2237_v37 }
  0xbf   : > { %v787_v62 = vadd.f32 %v786_v56, %v2811_v48  ;;  %v785_v0 = vadd.f32 %v784_v58, %v783_v52  ;;  %v2333_v52 = vld [vmem:[#allocation4 + $0x1e0] sm:$0xf] }
  0xc0   : > { %v2334_v56 = vor.u32 %v2558_v54, %v2333_v52  ;;  %v2519_v52 = vld [vmem:[#allocation4 + $0xb4] sm:$0xf] }
  0xc1   : > { %v788_v3 = vrot.slane %v787_v62, 2  ;;  %v710_v4 = vpop.f32.mrf.mxu2  ;;  %v811_v6 = vmul.f32 %v2814_v61, %v785_v0 }
  0xc2   : > { %v723_v7 = vpop.f32.mrf.mxu3  ;;  %1357 = vmatpush.bf16.msra.mxu3 %v2334_v56  ;;  %v2127_v4 = vld [vmem:[#allocation4 + $0x48] sm:$0xf0]  ;;  %1383 = vmatpush.bf16.msrb.mxu1 %v2210_v60  ;;  %v2532_v60 = vld [vmem:[#allocation4 + $0x114] sm:$0xf0] }
  0xc3   : > { %v789_v10 = vadd.f32 %v788_v3, %v787_v62  ;;  %v2818_v15 = vsub.f32 %v696_v28, %v811_v6  ;;  %v2143_v28 = vld [vmem:[#allocation4 + $0x68] sm:$0xf0]  ;;  %v2253_v62 = vld [vmem:[#allocation4 + $0x140] sm:$0xf]  ;;  %v2505_v3 = vld [vmem:[#allocation4 + $0x44] sm:$0xf] }
  0xc4   : > { %v2146_v31 = vor.u32 %v2509_v25, %v2143_v28  ;;  %v2254_v2 = vor.u32 %v2538_v63, %v2253_v62  ;;  %v2130_v7 = vor.u32 %v2505_v3, %v2127_v4  ;;  %v2317_v25 = vld [vmem:[#allocation4 + $0x1c0] sm:$0xf] }
  0xc5   : > { %v790_v49 = vrot.slane %v789_v10, 1  ;;  %v819_v21 = vmul.f32 %v2818_v15, %v2818_v15 }
  0xc6   : > { %1370 = vmatpush.bf16.msrb.mxu0 %v2146_v31  ;;  %1346 = vmatpush.bf16.msra.mxu2 %v2254_v2  ;;  %v2191_v31 = vld [vmem:[#allocation4 + $0xc8] sm:$0xf0] }
  0xc7   : > { %v791_v22 = vadd.f32 %v790_v49, %v789_v10  ;;  %v823_v26 = vrot.slane %v819_v21, 4  ;;  %1358 = vmatpush.bf16.msra.mxu3 %v2326_v11  ;;  %1384 = vmatpush.bf16.msrb.mxu1 %v2202_v17  ;;  %v2194_v36 = vor.u32 %v2521_v27, %v2191_v31  ;;  %v2221_v17 = vld [vmem:[#allocation4 + $0x100] sm:$0xf]  ;;  %v2293_v27 = vld [vmem:[#allocation4 + $0x190] sm:$0xf] }
  0xc9   : > { %v812_v30 = vmul.f32 %v2814_v61, %v791_v22  ;;  %v824_v35 = vadd.f32 %v823_v26, %v819_v21  ;;  %v2119_v21 = vld [vmem:[#allocation4 + $0x38] sm:$0xf0]  ;;  %v2554_v26 = vld [vmem:[#allocation4 + $0x1c4] sm:$0xf0] }
  0xca   : > { %1371 = vmatpush.bf16.msrb.mxu0 %v2138_v51  ;;  %v2122_v24 = vor.u32 %v2503_v20, %v2119_v21  ;;  %1347 = vmatpush.bf16.msra.mxu2 %v2246_v53  ;;  %v2552_v51 = vld [vmem:[#allocation4 + $0x1b4] sm:$0xf0]  ;;  %v2178_v20 = vor.u32 %v2517_v12, %v2175_v13  ;;  %v2222_v21 = vor.u32 %v2530_v18, %v2221_v17 }
  0xcb   : > { %v2824_v40 = vsub.f32 %v2811_v48, %v812_v30  ;;  %v825_v45 = vrot.slane %v824_v35, 2  ;;  %v2318_v30 = vor.u32 %v2554_v26, %v2317_v25  ;;  %1385 = vmatpush.bf16.msrb.mxu1 %v2194_v36  ;;  %v2279_v26 = vld [vmem:[#allocation4 + $0x178] sm:$0xf0]  ;;  %v2856_v36 = vld [vmem:[%s3003_s5] ss:$2 sm:$0xf] }
  0xcd   : > { %v820_v50 = vmul.f32 %v2824_v40, %v2824_v40  ;;  %v826_v48 = vadd.f32 %v825_v45, %v824_v35  ;;  %1359 = vmatpush.bf16.msra.mxu3 %v2318_v30 }
  0xce   : > { %1372 = vmatpush.bf16.msrb.mxu0 %v2130_v7  ;;  %1348 = vmatpush.bf16.msra.mxu2 %v2238_v42  ;;  %v2550_v7 = vld [vmem:[#allocation4 + $0x1a4] sm:$0xf0]  ;;  %v2541_v42 = vld [vmem:[#allocation4 + $0x164] sm:$0xf] }
  0xcf   : > { %v829_v58 = vrot.slane %v820_v50, 4  ;;  %v827_v0 = vrot.slane %v826_v48, 1 }
  0xd1   : > { %v734_v59 = vpop.f32.mrf.mxu0  ;;  %v830_v5 = vadd.f32 %v829_v58, %v820_v50  ;;  %v828_v10 = vadd.f32 %v827_v0, %v826_v48  ;;  %v2309_v50 = vld [vmem:[#allocation4 + $0x1b0] sm:$0xf]  ;;  %v2183_v48 = vld [vmem:[#allocation4 + $0xb8] sm:$0xf0]  ;;  %v2499_v0 = vld [vmem:[#allocation4 + $0x14] sm:$0xf] }
  0xd2   : > { %v747_v1 = vpop.f32.mrf.mxu1  ;;  %1373 = vmatpush.bf16.msrb.mxu0 %v2122_v24  ;;  %v2310_v55 = vor.u32 %v2552_v51, %v2309_v50  ;;  %v2186_v58 = vor.u32 %v2519_v52, %v2183_v48  ;;  %v2546_v50 = vld [vmem:[#allocation4 + $0x184] sm:$0xf0]  ;;  %v2513_v48 = vld [vmem:[#allocation4 + $0x84] sm:$0xf] }
  0xd3   : > { %v2828_v6 = vadd.f32 %v747_v1, %v734_v59  ;;  %v831_v14 = vrot.slane %v830_v5, 2  ;;  %v847_v49 = vmul.f32 %v828_v10, %v2814_v61  ;;  %v2229_v59 = vld [vmem:[#allocation4 + $0x110] sm:$0xf]  ;;  %v2103_v1 = vld [vmem:[#allocation4 + $0x18] sm:$0xf0] }
  0xd4   : > { %1360 = vmatpush.bf16.msra.mxu3 %v2310_v55  ;;  %v2230_v63 = vor.u32 %v2532_v60, %v2229_v59  ;;  %1386 = vmatpush.bf16.msrb.mxu1 %v2186_v58  ;;  %v2106_v4 = vor.u32 %v2499_v0, %v2103_v1  ;;  %v2869_v55 = vld [vmem:[%s3003_s5 + $0x1] ss:$2 sm:$0xf]  ;;  %v2559_v60 = vld [vmem:[#allocation4 + $0x1f4] sm:$0xf] }
  0xd5   : > { %v792_v16 = vrot.slane %v2828_v6, 4  ;;  %v832_v22 = vadd.f32 %v831_v14, %v830_v5  ;;  %v2833_v28 = vadd.f32 1e-05, %v847_v49  ;;  %v2301_v5 = vld [vmem:[#allocation4 + $0x1a0] sm:$0xf] }
  0xd6   : > { %1374 = vmatpush.bf16.msrb.mxu0 %v2114_v47  ;;  %1349 = vmatpush.bf16.msra.mxu2 %v2230_v63  ;;  %v2302_v11 = vor.u32 %v2550_v7, %v2301_v5  ;;  %v2285_v47 = vld [vmem:[#allocation4 + $0x180] sm:$0xf]  ;;  %v900_v63 = vperm.slane %v2856_v36, 0  ;;  %v2263_v5 = vld [vmem:[#allocation4 + $0x158] sm:$0xf0] }
  0xd7   : > { %v793_v23 = vadd.f32 %v792_v16, %v2828_v6  ;;  %v833_v32 = vrot.slane %v832_v22, 1  ;;  %2620 = vrsqrt.f32 %v2833_v28  ;;  %vm861_vm2 = vweird.f32 %v2833_v28 }
  0xd8   : > { %1361 = vmatpush.bf16.msra.mxu3 %v2302_v11  ;;  %1387 = vmatpush.bf16.msrb.mxu1 %v2178_v20  ;;  %v2286_v58 = vor.u32 %v2546_v50, %v2285_v47 }
  0xd9   : > { %v760_v29 = vpop.f32.mrf.mxu2  ;;  %v794_v33 = vrot.slane %v793_v23, 2  ;;  %v736_v35 = vpop.f32.mrf.mxu0  ;;  %v834_v45 = vadd.f32 %v833_v32, %v832_v22  ;;  %v2095_v22 = vld [vmem:[#allocation4 + $0x8] sm:$0xf0] }
  0xda   : > { %v773_v34 = vpop.f32.mrf.mxu3  ;;  %v749_v41 = vpop.f32.mrf.mxu1  ;;  %1375 = vmatpush.bf16.msrb.mxu0 %v2106_v4  ;;  %v2098_v25 = vor.u32 %v2497_v19, %v2095_v22  ;;  %1350 = vmatpush.bf16.msra.mxu2 %v2222_v21  ;;  %v2167_v35 = vld [vmem:[#allocation4 + $0x98] sm:$0xf0]  ;;  %v2539_v4 = vld [vmem:[#allocation4 + $0x154] sm:$0xf] }
  0xdb   : > { %v2836_v39 = vadd.f32 %v773_v34, %v760_v29  ;;  %v795_v46 = vadd.f32 %v794_v33, %v793_v23  ;;  %v848_v56 = vmul.f32 %v834_v45, %v2814_v61  ;;  %v2543_v23 = vld [vmem:[#allocation4 + $0x174] sm:$0xf]  ;;  %v2548_v29 = vld [vmem:[#allocation4 + $0x194] sm:$0xf0] }
  0xdc   : > { %v2282_v32 = vor.u32 %v2543_v23, %v2279_v26  ;;  %v2294_v33 = vor.u32 %v2548_v29, %v2293_v27  ;;  %v2515_v34 = vld [vmem:[#allocation4 + $0x94] sm:$0xf]  ;;  %v901_v26 = vperm.slane %v2856_v36, 1 }
  0xdd   : > { %v798_v54 = vrot.slane %v2836_v39, 4  ;;  %v796_v57 = vrot.slane %v795_v46, 1  ;;  %v2841_v2 = vadd.f32 1e-05, %v848_v56  ;;  %v2843_v8 = vpop.eup %2620  ;;  %v2170_v38 = vor.u32 %v2515_v34, %v2167_v35  ;;  %v2159_v56 = vld [vmem:[#allocation4 + $0x88] sm:$0xf0] }
  0xde   : > { %v856_v14 = vmul.f32 %v2843_v8, %v2833_v28  ;;  %1376 = vmatpush.bf16.msrb.mxu0 %v2098_v25  ;;  %1395 = vmatpush.bf16.msrb.mxu2 %v2282_v32  ;;  %vm862_vm1 = vweird.f32 %v2843_v8  ;;  %v2162_v59 = vor.u32 %v2513_v48, %v2159_v56  ;;  %v2327_v25 = vld [vmem:[#allocation4 + $0x1d8] sm:$0xf0]  ;;  %v2535_v34 = vld [vmem:[#allocation4 + $0x134] sm:$0xf] }
  0xdf   : > { %v799_v62 = vadd.f32 %v798_v54, %v2836_v39  ;;  %v797_v3 = vadd.f32 %v796_v57, %v795_v46  ;;  %2622 = vrsqrt.f32 %v2841_v2  ;;  %1362 = vmatpush.bf16.msra.mxu3 %v2294_v33  ;;  %v2274_v46 = vor.u32 %v2541_v42, %v2271_v43  ;;  %1388 = vmatpush.bf16.msrb.mxu1 %v2170_v38  ;;  %vm863_vm3 = vmor %vm861_vm2, %vm862_vm1  ;;  %v2247_v35 = vld [vmem:[#allocation4 + $0x138] sm:$0xf0]  ;;  %v2553_v43 = vld [vmem:[#allocation4 + $0x1c4] sm:$0xf] }
  0xe0   : > { %v857_v24 = vmul.f32 %v2843_v8, %v856_v14  ;;  %v2557_v14 = vld [vmem:[#allocation4 + $0x1e4] sm:$0xf]  ;;  %vm871_vm5 = vweird.f32 %v2841_v2  ;;  %v914_v38 = vperm.slane %v2869_v55, 1 }
  0xe1   : > { %v800_v9 = vrot.slane %v799_v62, 2  ;;  %v762_v10 = vpop.f32.mrf.mxu2  ;;  %v813_v49 = vmul.f32 %v2814_v61, %v797_v3 }
  0xe2   : > { %v775_v16 = vpop.f32.mrf.mxu3  ;;  %v858_v37 = vmul.f32 0.5, %v857_v24  ;;  %1396 = vmatpush.bf16.msrb.mxu2 %v2274_v46  ;;  %v2555_v24 = vld [vmem:[#allocation4 + $0x1d4] sm:$0xf]  ;;  %v2533_v46 = vld [vmem:[#allocation4 + $0x124] sm:$0xf] }
  0xe3   : > { %v801_v53 = vadd.f32 %v800_v9, %v799_v62  ;;  %v2851_v30 = vsub.f32 %v2828_v6, %v813_v49  ;;  %v2343_v62 = vld [vmem:[#allocation4 + $0x1f8] sm:$0xf0]  ;;  %1363 = vmatpush.bf16.msra.mxu3 %v2286_v58  ;;  %v2266_v9 = vor.u32 %v2539_v4, %v2263_v5  ;;  %1389 = vmatpush.bf16.msrb.mxu1 %v2162_v59  ;;  %v2335_v16 = vld [vmem:[#allocation4 + $0x1e8] sm:$0xf0] }
  0xe4   : > { %v859_v45 = vsub.f32 1.5, %v858_v37  ;;  %v2346_v7 = vor.u32 %v2559_v60, %v2343_v62  ;;  %v2338_v17 = vor.u32 %v2557_v14, %v2335_v16  ;;  %v2330_v29 = vor.u32 %v2555_v24, %v2327_v25  ;;  %v2311_v58 = vld [vmem:[#allocation4 + $0x1b8] sm:$0xf0]  ;;  %v2547_v14 = vld [vmem:[#allocation4 + $0x194] sm:$0xf] }
  0xe5   : > { %v802_v31 = vrot.slane %v801_v53, 1  ;;  %v821_v41 = vmul.f32 %v2851_v30, %v2851_v30  ;;  %v2860_v44 = vpop.eup %2622  ;;  %v2295_v16 = vld [vmem:[#allocation4 + $0x198] sm:$0xf0]  ;;  %v902_v24 = vperm.slane %v2856_v36, 2 }
  0xe6   : > { %v866_v51 = vmul.f32 %v2860_v44, %v2841_v2  ;;  %v860_v57 = vmul.f32 %v2843_v8, %v859_v45  ;;  %vm872_vm4 = vweird.f32 %v2860_v44  ;;  %1397 = vmatpush.bf16.msrb.mxu2 %v2266_v9  ;;  %v2319_v45 = vld [vmem:[#allocation4 + $0x1c8] sm:$0xf0] }
  0xe7   : > { %v803_v6 = vadd.f32 %v802_v31, %v801_v53  ;;  %v835_v52 = vrot.slane %v821_v41, 4  ;;  %1408 = vmatpush.bf16.msrb.mxu3 %v2346_v7  ;;  %v2255_v53 = vld [vmem:[#allocation4 + $0x148] sm:$0xf0]  ;;  %vm873_vm6 = vmor %vm871_vm5, %vm872_vm4  ;;  %v2529_v7 = vld [vmem:[#allocation4 + $0x104] sm:$0xf] }
  0xe8   : > { %v867_v0 = vmul.f32 %v2860_v44, %v866_v51  ;;  %v864_v28 = vsel %vm863_vm3, %v2843_v8, %v860_v57  ;;  %v2239_v51 = vld [vmem:[#allocation4 + $0x128] sm:$0xf0]  ;;  %v2551_v57 = vld [vmem:[#allocation4 + $0x1b4] sm:$0xf]  ;;  %vm1655_vm3 = vcmask 523264  }
  0xe9   : > { %v814_v54 = vmul.f32 %v2814_v61, %v803_v6  ;;  %v836_v1 = vadd.f32 %v835_v52, %v821_v41  ;;  %v895_v10 = vmul.f32 %v864_v28, %v2818_v15  ;;  %v2537_v15 = vld [vmem:[#allocation4 + $0x144] sm:$0xf]  ;;  %v2250_v41 = vor.u32 %v2535_v34, %v2247_v35  ;;  %v2303_v28 = vld [vmem:[#allocation4 + $0x1a8] sm:$0xf0] }
  0xea   : > { %v868_v11 = vmul.f32 0.5, %v867_v0  ;;  %v2258_v20 = vor.u32 %v2537_v15, %v2255_v53  ;;  %v2242_v48 = vor.u32 %v2533_v46, %v2239_v51  ;;  %v2314_v60 = vor.u32 %v2551_v57, %v2311_v58  ;;  %v2231_v0 = vld [vmem:[#allocation4 + $0x118] sm:$0xf0]  ;;  %v2223_v9 = vld [vmem:[#allocation4 + $0x108] sm:$0xf0] }
  0xeb   : > { %v2878_v3 = vsub.f32 %v2836_v39, %v814_v54  ;;  %v837_v12 = vrot.slane %v836_v1, 2  ;;  %v913_v39 = vperm.slane %v2869_v55, 0  ;;  %v908_v8 = vmul.f32 %v900_v63, %v895_v10  ;;  %1409 = vmatpush.bf16.msrb.mxu3 %v2338_v17  ;;  %v2531_v63 = vld [vmem:[#allocation4 + $0x114] sm:$0xf]  ;;  %v2287_v15 = vld [vmem:[#allocation4 + $0x188] sm:$0xf0] }
  0xec   : > { %v869_v18 = vsub.f32 1.5, %v868_v11  ;;  %1398 = vmatpush.bf16.msrb.mxu2 %v2258_v20  ;;  %v2234_v5 = vor.u32 %v2531_v63, %v2231_v0  ;;  %v903_v34 = vperm.slane %v2856_v36, 3 }
  0xed   : > { %v822_v13 = vmul.f32 %v2878_v3, %v2878_v3  ;;  %v838_v19 = vadd.f32 %v837_v12, %v836_v1  ;;  %v921_v27 = vadd.f32 %v913_v39, %v908_v8  ;;  %v2549_v1 = vld [vmem:[#allocation4 + $0x1a4] sm:$0xf]  ;;  %v2298_v8 = vor.u32 %v2547_v14, %v2295_v16  ;;  %v2564_v14 = vld [vmem:[%s3001_s3 + $0x18] sm:$0xff] }
  0xee   : > { %v870_v21 = vmul.f32 %v2860_v44, %v869_v18  ;;  %v2306_v11 = vor.u32 %v2549_v1, %v2303_v28  ;;  %v2566_v1 = vld [vmem:[%s3001_s3 + $0x28] sm:$0xff]  ;;  %v2576_v16 = vld [vmem:[%s3001_s3 + $0x78] sm:$0xff] }
  0xef   : > { %v841_v49 = vrot.slane %v822_v13, 4  ;;  %v839_v22 = vrot.slane %v838_v19, 1  ;;  %v925_v37 = vmax.f32 %v921_v27, 0.0  ;;  %1410 = vmatpush.bf16.msrb.mxu3 %v2330_v29  ;;  %v915_v29 = vperm.slane %v2869_v55, 2 }
  0xf0   : > { %v874_v31 = vsel %vm873_vm6, %v2860_v44, %v870_v21  ;;  %v2322_v44 = vor.u32 %v2553_v43, %v2319_v45  ;;  %1399 = vmatpush.bf16.msrb.mxu2 %v2250_v41  ;;  %v916_v41 = vperm.slane %v2869_v55, 3 }
  0xf1   : > { %v842_v23 = vadd.f32 %v841_v49, %v822_v13  ;;  %v840_v32 = vadd.f32 %v839_v22, %v838_v19  ;;  %v896_v2 = vmul.f32 %v874_v31, %v2824_v40  ;;  %v929_v50 = vpack.c.bf16 %v925_v37, %v925_v37  ;;  %v2545_v49 = vld [vmem:[#allocation4 + $0x184] sm:$0xf] }
  0xf2   : > { %v2226_v13 = vor.u32 %v2529_v7, %v2223_v9  ;;  %v2290_v21 = vor.u32 %v2545_v49, %v2287_v15  ;;  %v2565_v7 = vld [vmem:[%s3001_s3 + $0x20] sm:$0xff]  ;;  %v2563_v49 = vld [vmem:[%s3001_s3 + $0x10] sm:$0xff] }
  0xf3   : > { %v843_v33 = vrot.slane %v842_v23, 2  ;;  %v849_v6 = vmul.f32 %v840_v32, %v2814_v61  ;;  %v909_v47 = vmul.f32 %v901_v26, %v896_v2  ;;  %1325 = vmatmul.bf16.vlgmr.msra.gmra.mxu0 %v929_v50  ;;  %1411 = vmatpush.bf16.msrb.mxu3 %v2322_v44  ;;  %v2575_v15 = vld [vmem:[%s3001_s3 + $0x70] sm:$0xff] }
  0xf4   : > { %1400 = vmatpush.bf16.msrb.mxu2 %v2242_v48 }
  0xf5   : > { %v844_v42 = vadd.f32 %v843_v33, %v842_v23  ;;  %v853_v52 = vadd.f32 1e-05, %v849_v6  ;;  %v922_v40 = vadd.f32 %v914_v38, %v909_v47 }
  0xf7   : > { %v845_v54 = vrot.slane %v844_v42, 1  ;;  %2624 = vrsqrt.f32 %v853_v52  ;;  %v926_v59 = vmax.f32 %v922_v40, 0.0  ;;  %1412 = vmatpush.bf16.msrb.mxu3 %v2314_v60  ;;  %vm881_vm8 = vweird.f32 %v853_v52  ;;  %v2567_v60 = vld [vmem:[%s3001_s3 + $0x30] sm:$0xff] }
  0xf8   : > { %1401 = vmatpush.bf16.msrb.mxu2 %v2234_v5 }
  0xf9   : > { %v846_v56 = vadd.f32 %v845_v54, %v844_v42  ;;  %v930_v4 = vpack.c.bf16 %v926_v59, %v926_v59 }
  0xfb   : > { %v850_v62 = vmul.f32 %v846_v56, %v2814_v61  ;;  %1338 = vmatmul.bf16.vlgmr.msra.gmra.mxu1 %v930_v4  ;;  %1413 = vmatpush.bf16.msrb.mxu3 %v2306_v11  ;;  %v2568_v56 = vld [vmem:[%s3001_s3 + $0x38] sm:$0xff] }
  0xfc   : > { %1402 = vmatpush.bf16.msrb.mxu2 %v2226_v13  ;;  %1627 = vmatpush.bf16.msra.mxu0 %v2568_v56  ;;  %v2347_v56 = vld [vmem:[%s3003_s5 + $0x8] ss:$2 sm:$0x3] }
  0xfd   : > { %v854_v10 = vadd.f32 1e-05, %v850_v62  ;;  %v2625_v12 = vpop.eup %2624  ;;  %1640 = vmatpush.bf16.msra.mxu1 %v2576_v16  ;;  %v1483_v16 = vperm.slane %v2347_v56, 1 }
  0xfe   : > { %v876_v39 = vmul.f32 %v2625_v12, %v853_v52  ;;  %vm882_vm7 = vweird.f32 %v2625_v12 }
  0xff   : > { %2626 = vrsqrt.f32 %v854_v10  ;;  %1414 = vmatpush.bf16.msrb.mxu3 %v2298_v8  ;;  %vm883_vm9 = vmor %vm881_vm8, %vm882_vm7  ;;  %vm891_vm11 = vweird.f32 %v854_v10 }
 0x100   : > { %v877_v17 = vmul.f32 %v2625_v12, %v876_v39  ;;  %1628 = vmatpush.bf16.msra.mxu0 %v2567_v60  ;;  %v2348_v60 = vld [vmem:[%s3003_s5 + $0x9] ss:$2 sm:$0x3] }
 0x101   : > { %1641 = vmatpush.bf16.msra.mxu1 %v2575_v15 }
 0x102   : > { %v878_v18 = vmul.f32 0.5, %v877_v17 }
 0x103   : > { %1377 = vmatmul.bf16.vlgmr.msrb.gmra.mxu0 %v929_v50  ;;  %1415 = vmatpush.bf16.msrb.mxu3 %v2290_v21 }
 0x104   : > { %v879_v53 = vsub.f32 1.5, %v878_v18  ;;  %1629 = vmatpush.bf16.msra.mxu0 %v2566_v1  ;;  %v1489_v1 = vperm.slane %v2348_v60, 0 }
 0x105   : > { %v2627_v19 = vpop.eup %2626 }
 0x106   : > { %v886_v20 = vmul.f32 %v2627_v19, %v854_v10  ;;  %v880_v22 = vmul.f32 %v2625_v12, %v879_v53  ;;  %vm892_vm10 = vweird.f32 %v2627_v19 }
 0x107   : > { %vm893_vm12 = vmor %vm891_vm11, %vm892_vm10 }
 0x108   : > { %v887_v23 = vmul.f32 %v2627_v19, %v886_v20  ;;  %v884_v25 = vsel %vm883_vm9, %v2625_v12, %v880_v22  ;;  %1630 = vmatpush.bf16.msra.mxu0 %v2565_v7 }
 0x109   : > { %v897_v27 = vmul.f32 %v884_v25, %v2851_v30  ;;  %v2574_v25 = vld [vmem:[%s3001_s3 + $0x68] sm:$0xff] }
 0x10a   : > { %v888_v26 = vmul.f32 0.5, %v887_v23  ;;  %1642 = vmatpush.bf16.msra.mxu1 %v2574_v25 }
 0x10b   : > { %v910_v32 = vmul.f32 %v902_v24, %v897_v27  ;;  %1390 = vmatmul.bf16.vlgmr.msrb.gmra.mxu1 %v930_v4  ;;  %v2562_v24 = vld [vmem:[%s3001_s3 + $0x8] sm:$0xff] }
 0x10c   : > { %v889_v31 = vsub.f32 1.5, %v888_v26  ;;  %1631 = vmatpush.bf16.msra.mxu0 %v2564_v14 }
 0x10d   : > { %v923_v35 = vadd.f32 %v915_v29, %v910_v32  ;;  %v2561_v32 = vld [vmem:[%s3001_s3] sm:$0xff] }
 0x10e   : > { %v890_v33 = vmul.f32 %v2627_v19, %v889_v31 }
 0x10f   : > { %v927_v38 = vmax.f32 %v923_v35, 0.0 }
 0x110   : > { %v894_v2 = vsel %vm893_vm12, %v2627_v19, %v890_v33  ;;  %1632 = vmatpush.bf16.msra.mxu0 %v2563_v49  ;;  %v2573_v33 = vld [vmem:[%s3001_s3 + $0x60] sm:$0xff] }
 0x111   : > { %v898_v37 = vmul.f32 %v894_v2, %v2878_v3  ;;  %v931_v30 = vpack.c.bf16 %v927_v38, %v927_v38  ;;  %1643 = vmatpush.bf16.msra.mxu1 %v2573_v33  ;;  %v2572_v38 = vld [vmem:[%s3001_s3 + $0x58] sm:$0xff] }
 0x113   : > { %v911_v6 = vmul.f32 %v903_v34, %v898_v37  ;;  %1351 = vmatmul.bf16.vlgmr.msra.gmra.mxu2 %v931_v30 }
 0x114   : > { %1633 = vmatpush.bf16.msra.mxu0 %v2562_v24 }
 0x115   : > { %v924_v42 = vadd.f32 %v916_v41, %v911_v6  ;;  %1644 = vmatpush.bf16.msra.mxu1 %v2572_v38  ;;  %v2579_v38 = vld [vmem:[%s3002_s4 + $0x10] sm:$0xff] }
 0x117   : > { %v928_v43 = vmax.f32 %v924_v42, 0.0 }
 0x118   : > { %1634 = vmatpush.bf16.msra.mxu0 %v2561_v32 }
 0x119   : > { %v932_v45 = vpack.c.bf16 %v928_v43, %v928_v43  ;;  %v2571_v43 = vld [vmem:[%s3001_s3 + $0x50] sm:$0xff] }
 0x11a   : > { %1645 = vmatpush.bf16.msra.mxu1 %v2571_v43 }
 0x11b   : > { %1364 = vmatmul.bf16.vlgmr.msra.gmra.mxu3 %v932_v45 }
 0x123   : > { %1403 = vmatmul.bf16.vlgmr.msrb.gmra.mxu2 %v931_v30 }
 0x12b   : > { %1416 = vmatmul.bf16.vlgmr.msrb.gmra.mxu3 %v932_v45 }
 0x170   : > { %v1326_v46 = vpop.f32.mrf.mxu0 }
 0x178   : > { %v1339_v47 = vpop.f32.mrf.mxu1  ;;  %v1328_v50 = vpop.f32.mrf.mxu0 }
 0x179   : > { %v1340_v48 = vadd.f32 %v1339_v47, %v1326_v46  ;;  %v2570_v47 = vld [vmem:[%s3001_s3 + $0x48] sm:$0xff] }
 0x17a   : > { %1646 = vmatpush.bf16.msra.mxu1 %v2570_v47 }
 0x180   : > { %v1341_v36 = vpop.f32.mrf.mxu1  ;;  %v1378_v44 = vpop.f32.mrf.mxu0 }
 0x181   : > { %v2569_v36 = vld [vmem:[%s3001_s3 + $0x40] sm:$0xff] }
 0x182   : > { %1647 = vmatpush.bf16.msra.mxu1 %v2569_v36 }
 0x188   : > { %v1391_v51 = vpop.f32.mrf.mxu1  ;;  %v1380_v52 = vpop.f32.mrf.mxu0 }
 0x189   : > { %v1392_v9 = vadd.f32 %v1391_v51, %v1378_v44 }
 0x190   : > { %v1393_v3 = vpop.f32.mrf.mxu1 }
 0x196   : > { %v1352_v54 = vpop.f32.mrf.mxu2 }
 0x197   : > { %v1353_v55 = vadd.f32 %v1352_v54, %v1340_v48 }
 0x19e   : > { %v1365_v40 = vpop.f32.mrf.mxu3  ;;  %v1354_v58 = vpop.f32.mrf.mxu2 }
 0x19f   : > { %v1366_v57 = vadd.f32 %v1365_v40, %v1353_v55 }
 0x1a1   : > { %v1425_v59 = vrot.slane %v1366_v57, 4 }
 0x1a3   : > { %v1426_v62 = vadd.f32 %v1425_v59, %v1366_v57 }
 0x1a5   : > { %v1427_v63 = vrot.slane %v1426_v62, 2 }
 0x1a6   : > { %v1367_v0 = vpop.f32.mrf.mxu3  ;;  %v1404_v5 = vpop.f32.mrf.mxu2 }
 0x1a7   : > { %v1428_v4 = vadd.f32 %v1427_v63, %v1426_v62  ;;  %v1405_v12 = vadd.f32 %v1404_v5, %v1392_v9  ;;  %v1482_v62 = vperm.slane %v2347_v56, 0 }
 0x1a9   : > { %v1429_v28 = vrot.slane %v1428_v4, 1 }
 0x1ab   : > { %v1430_v10 = vadd.f32 %v1429_v28, %v1428_v4 }
 0x1ad   : > { %v1437_v11 = vmul.f32 %v1430_v10, %v2814_v61 }
 0x1ae   : > { %v1417_v13 = vpop.f32.mrf.mxu3  ;;  %v1406_v8 = vpop.f32.mrf.mxu2 }
 0x1af   : > { %v2921_v39 = vsub.f32 %v1366_v57, %v1437_v11  ;;  %v1418_v17 = vadd.f32 %v1417_v13, %v1405_v12 }
 0x1b1   : > { %v1441_v18 = vmul.f32 %v2921_v39, %v2921_v39  ;;  %v1431_v19 = vrot.slane %v1418_v17, 4 }
 0x1b3   : > { %v1443_v53 = vrot.slane %v1441_v18, 4  ;;  %v1432_v20 = vadd.f32 %v1431_v19, %v1418_v17 }
 0x1b5   : > { %v1444_v21 = vadd.f32 %v1443_v53, %v1441_v18  ;;  %v1433_v22 = vrot.slane %v1432_v20, 2  ;;  %v1490_v18 = vperm.slane %v2348_v60, 1 }
 0x1b6   : > { %v1419_v23 = vpop.f32.mrf.mxu3 }
 0x1b7   : > { %v1445_v26 = vrot.slane %v1444_v21, 2  ;;  %v1434_v27 = vadd.f32 %v1433_v22, %v1432_v20 }
 0x1b9   : > { %v1446_v29 = vadd.f32 %v1445_v26, %v1444_v21  ;;  %v1435_v31 = vrot.slane %v1434_v27, 1 }
 0x1bb   : > { %v1447_v34 = vrot.slane %v1446_v29, 1  ;;  %v1436_v35 = vadd.f32 %v1435_v31, %v1434_v27 }
 0x1bd   : > { %v1448_v2 = vadd.f32 %v1447_v34, %v1446_v29  ;;  %v1438_v37 = vmul.f32 %v1436_v35, %v2814_v61  ;;  %v2580_v35 = vld [vmem:[%s3002_s4 + $0x18] sm:$0xff] }
 0x1be   : > { %1733 = vmatpush.bf16.msra.mxu2 %v2580_v35 }
 0x1bf   : > { %v1455_v41 = vmul.f32 %v1448_v2, %v2814_v61  ;;  %v1440_v6 = vsub.f32 %v1418_v17, %v1438_v37 }
 0x1c1   : > { %v1457_v30 = vadd.f32 1e-05, %v1455_v41  ;;  %v1442_v42 = vmul.f32 %v1440_v6, %v1440_v6 }
 0x1c2   : > { %1734 = vmatpush.bf16.msra.mxu2 %v2579_v38 }
 0x1c3   : > { %2628 = vrsqrt.f32 %v1457_v30  ;;  %v1449_v45 = vrot.slane %v1442_v42, 4  ;;  %vm1465_vm14 = vweird.f32 %v1457_v30 }
 0x1c5   : > { %v1450_v46 = vadd.f32 %v1449_v45, %v1442_v42  ;;  %v2577_v45 = vld [vmem:[%s3002_s4] sm:$0xff] }
 0x1c7   : > { %v1451_v50 = vrot.slane %v1450_v46, 2 }
 0x1c9   : > { %v2629_v44 = vpop.eup %2628  ;;  %v1452_v51 = vadd.f32 %v1451_v50, %v1450_v46 }
 0x1ca   : > { %v1460_v52 = vmul.f32 %v2629_v44, %v1457_v30  ;;  %vm1466_vm13 = vweird.f32 %v2629_v44  ;;  %v2578_v30 = vld [vmem:[%s3002_s4 + $0x8] sm:$0xff] }
 0x1cb   : > { %v1453_v3 = vrot.slane %v1452_v51, 1  ;;  %vm1467_vm15 = vmor %vm1465_vm14, %vm1466_vm13  ;;  %1735 = vmatpush.bf16.msra.mxu2 %v2578_v30 }
 0x1cc   : > { %v1461_v54 = vmul.f32 %v2629_v44, %v1460_v52 }
 0x1cd   : > { %v1454_v48 = vadd.f32 %v1453_v3, %v1452_v51 }
 0x1ce   : > { %v1462_v55 = vmul.f32 0.5, %v1461_v54 }
 0x1cf   : > { %v1456_v40 = vmul.f32 %v1454_v48, %v2814_v61  ;;  %1736 = vmatpush.bf16.msra.mxu2 %v2577_v45 }
 0x1d0   : > { %v1463_v57 = vsub.f32 1.5, %v1462_v55  ;;  %v2615_v55 = vld [vmem:[%s3003_s5 + $0xc] ss:$0 sm:$0xff] }
 0x1d1   : > { %v1458_v58 = vadd.f32 1e-05, %v1456_v40 }
 0x1d2   : > { %v1464_v59 = vmul.f32 %v2629_v44, %v1463_v57 }
 0x1d3   : > { %2630 = vrsqrt.f32 %v1458_v58  ;;  %vm1475_vm1 = vweird.f32 %v1458_v58 }
 0x1d4   : > { %v1468_v63 = vsel %vm1467_vm15, %v2629_v44, %v1464_v59 }
 0x1d5   : > { %v1479_v0 = vmul.f32 %v1468_v63, %v2921_v39 }
 0x1d7   : > { %v1486_v4 = vmul.f32 %v1482_v62, %v1479_v0  ;;  %v2617_v62 = vld [vmem:[%s3003_s5 + $0xe] ss:$0 sm:$0xff] }
 0x1d9   : > { %v2631_v5 = vpop.eup %2630  ;;  %v1493_v28 = vadd.f32 %v1489_v1, %v1486_v4 }
 0x1da   : > { %v1470_v7 = vmul.f32 %v2631_v5, %v1458_v58  ;;  %vm1476_vm0 = vweird.f32 %v2631_v5 }
 0x1db   : > { %v1495_v9 = vmax.f32 %v1493_v28, 0.0  ;;  %vm1477_vm2 = vmor %vm1475_vm1, %vm1476_vm0 }
 0x1dc   : > { %v1471_v10 = vmul.f32 %v2631_v5, %v1470_v7 }
 0x1dd   : > { %v1497_v11 = vpack.c.bf16 %v1495_v9, %v1495_v9 }
 0x1de   : > { %v1472_v12 = vmul.f32 0.5, %v1471_v10 }
 0x1df   : > { %1635 = vmatmul.bf16.vlgmr.msra.gmra.mxu0 %v1497_v11 }
 0x1e0   : > { %v1473_v13 = vsub.f32 1.5, %v1472_v12 }
 0x1e2   : > { %v1474_v14 = vmul.f32 %v2631_v5, %v1473_v13 }
 0x1e4   : > { %v1478_v17 = vsel %vm1477_vm2, %v2631_v5, %v1474_v14 }
 0x1e5   : > { %v1480_v8 = vmul.f32 %v1478_v17, %v1440_v6 }
 0x1e7   : > { %v1487_v39 = vmul.f32 %v1483_v16, %v1480_v8 }
 0x1e9   : > { %v1494_v19 = vadd.f32 %v1490_v18, %v1487_v39 }
 0x1eb   : > { %v1496_v49 = vmax.f32 %v1494_v19, 0.0 }
 0x1ed   : > { %v1498_v15 = vpack.c.bf16 %v1496_v49, %v1496_v49 }
 0x1ef   : > { %1648 = vmatmul.bf16.vlgmr.msra.gmra.mxu1 %v1498_v15 }
 0x25c   : > { %v1636_v53 = vpop.f32.mrf.mxu0 }
 0x264   : > { %v1638_v20 = vpop.f32.mrf.mxu0 }
 0x26c   : > { %v1649_v21 = vpop.f32.mrf.mxu1 }
 0x26d   : > { %v1650_v22 = vadd.f32 %v1649_v21, %v1636_v53 }
 0x26f   : > { %v1656_v23 = vsel %vm1655_vm3, %v1650_v22, 0.0 }
 0x270   : > { %v1657_v24 = vrot.slane %v1656_v23, 4 }
 0x272   : > { %v1658_v25 = vadd.f32 %v1657_v24, %v1656_v23 }
 0x274   : > { %v1659_v26 = vrot.slane %v1658_v25, 2  ;;  %v1651_v27 = vpop.f32.mrf.mxu1 }
 0x276   : > { %v1660_v29 = vadd.f32 %v1659_v26, %v1658_v25 }
 0x278   : > { %v1661_v31 = vrot.slane %v1660_v29, 1 }
 0x27a   : > { %v1662_v32 = vadd.f32 %v1661_v31, %v1660_v29 }
 0x27c   : > { %v1663_v33 = vmul.f32 %v1662_v32, %v2814_v61 }
 0x27e   : > { %v1664_v34 = vsub.f32 %v1650_v22, %v1663_v33 }
 0x280   : > { %v1665_v2 = vmul.f32 %v1664_v34, %v1664_v34 }
 0x282   : > { %v1666_v37 = vsel %vm1655_vm3, %v1665_v2, 0.0 }
 0x283   : > { %v1667_v41 = vrot.slane %v1666_v37, 4 }
 0x285   : > { %v1668_v6 = vadd.f32 %v1667_v41, %v1666_v37 }
 0x287   : > { %v1669_v42 = vrot.slane %v1668_v6, 2 }
 0x289   : > { %v1670_v43 = vadd.f32 %v1669_v42, %v1668_v6 }
 0x28b   : > { %v1671_v46 = vrot.slane %v1670_v43, 1 }
 0x28d   : > { %v1672_v47 = vadd.f32 %v1671_v46, %v1670_v43 }
 0x28f   : > { %v1673_v50 = vmul.f32 %v1672_v47, %v2814_v61  ;;  %v2616_v61 = vld [vmem:[%s3003_s5 + $0xd] ss:$0 sm:$0xff] }
 0x291   : > { %v1674_v36 = vadd.f32 1e-05, %v1673_v50 }
 0x293   : > { %2632 = vrsqrt.f32 %v1674_v36  ;;  %vm1681_vm5 = vweird.f32 %v1674_v36 }
 0x299   : > { %v2633_v44 = vpop.eup %2632 }
 0x29a   : > { %v1676_v51 = vmul.f32 %v2633_v44, %v1674_v36  ;;  %vm1682_vm4 = vweird.f32 %v2633_v44 }
 0x29b   : > { %vm1683_vm6 = vmor %vm1681_vm5, %vm1682_vm4 }
 0x29c   : > { %v1677_v52 = vmul.f32 %v2633_v44, %v1676_v51 }
 0x29e   : > { %v1678_v3 = vmul.f32 0.5, %v1677_v52 }
 0x2a0   : > { %v1679_v54 = vsub.f32 1.5, %v1678_v3 }
 0x2a2   : > { %v1680_v48 = vmul.f32 %v2633_v44, %v1679_v54 }
 0x2a4   : > { %v1684_v40 = vsel %vm1683_vm6, %v2633_v44, %v1680_v48 }
 0x2a5   : > { %v1685_v56 = vmul.f32 %v1684_v40, %v1664_v34 }
 0x2a7   : > { %v1687_v57 = vmul.f32 %v2615_v55, %v1685_v56 }
 0x2a9   : > { %v1689_v58 = vadd.f32 %v2616_v61, %v1687_v57 }
 0x2ab   : > { %v1690_v59 = vmax.f32 %v1689_v58, 0.0 }
 0x2ad   : > { %v1691_v60 = vpack.c.bf16 %v1690_v59, %v1690_v59 }
 0x2af   : > { %2429 = vmatmul.msk.bf16.vlgmr.msra.gmra.mxu2 %vm1655_vm3, %v1691_v60 }
 0x332   : > { %v1738_v63 = vpop.f32.mrf.mxu2 }
 0x333   : > { %v1739_v0 = vadd.f32 %v2617_v62, %v1738_v63 }
 0x335   : > { %v1742_v1 = vmul.f32 0.5, %v1739_v0 }
 0x337   : > { %2634 = vtanh.f32 %v1742_v1 }
 0x33a   : > { %v1740_v4 = vpop.f32.mrf.mxu2 }
 0x33d   : > { %v2635_v5 = vpop.eup %2634 }
 0x33e   : > { %v1744_v28 = vadd.f32 1.0, %v2635_v5 }
 0x340   : > { %v1745_v7 = vmul.f32 0.5, %v1744_v28 }
 0x342   : > { %1746 = vst [vmem:[%s283_s9] sm:$0xff] %v1745_v7 }
 0x343 PF: > { %s18_s21 = sadd.s32 1, %s2710_s21  }
 0x344   : > { %p15_p7 = scmp.ge.s32.totalorder %s18_s21, 6  }
 0x346   :  { %17 = sbr.rel (!%p15_p7) target bundleno = 2 (0x2), region = 86 }
 0x34b   :  { %1766 = vsyncpa [#allocation3], 1 }
 0x34c   :  { %1768 = vsyncpa [#allocation3 + $0x1], 1 }
 0x34d   :  { %1769 = vsyncpa [#allocation5], 1 }

</bundles_post_ra>
